<compile_context>
chip_gen: v7x
topology: tpu7x:2x2x1
jax: 0.10.0
libtpu: 0.0.40
codegen_flags: <defaults>
</compile_context>

<pallas_src>
import math

import jax
import jax.numpy as jnp
from jax.experimental import pallas as pl
from jax.experimental.pallas import tpu as pltpu  # noqa: F401  (TPU backend)

# ----------------------------- small ViT config -----------------------------
B = 2                     # batch
C = 3                     # image channels (RGB, as in ViT)
IMG = 16                  # image H = W
PATCH = 8                 # patch size
NPATCH = (IMG // PATCH) ** 2          # 4 patches
S = NPATCH + 1                         # 5 tokens (CLS + patches)
BS = B * S                             # 10 rows when batch is folded in
D = 32                    # hidden size
NH = 4                    # attention heads
HD = D // NH              # head dim = 8
MLP = 4 * D               # 128
NLAYERS = 2               # encoder layers
LORA_R = 8
LORA_ALPHA = 16
LN_EPS = 1e-12            # HF ViT layer_norm_eps
CP2 = C * PATCH * PATCH   # 192 = flattened patch size


# --------------------------------- kernel -----------------------------------
def _layer_norm(v, w, b):
    mu = jnp.mean(v, axis=-1, keepdims=True)
    var = jnp.mean((v - mu) ** 2, axis=-1, keepdims=True)
    return (v - mu) * jax.lax.rsqrt(var + LN_EPS) * w + b


def _bf16(v):
    return v.astype(jnp.bfloat16)


def fused_vit_kernel(
    patches_ref, mask_ref,
    pw_ref, pb_ref, cls_ref, pos_ref,
    ln1w_ref, ln1b_ref, wqkv_ref, bqkv_ref, wo_ref, bo_ref,
    ln2w_ref, ln2b_ref, w1_ref, b1_ref, w2_ref, b2_ref,
    lnw_ref, lnb_ref, hw1_ref, hb1_ref, hw2_ref, hb2_ref, hw3_ref, hb3_ref,
    out_ref,
):
    # ---- patch embedding for the whole batch at once ----
    # patches_ref: (B*NPATCH, CP2) f32, pw_ref: (CP2, D) bf16, pb_ref: (1, D) f32
    emb = jnp.dot(_bf16(patches_ref[...]), pw_ref[...],
                  preferred_element_type=jnp.float32) + pb_ref[...]

    pos = pos_ref[...]                                   # (S, D)  f32
    cls_row = cls_ref[...] + pos[0:1, :]                 # (1, D)
    rows = []
    for b in range(B):
        rows.append(cls_row)
        rows.append(emb[b * NPATCH:(b + 1) * NPATCH, :] + pos[1:, :])
    x = jnp.concatenate(rows, axis=0)                    # (BS, D) f32 tokens

    mask = mask_ref[...]                                 # (BS, BS) block-diag
    scale = 1.0 / math.sqrt(HD)

    # ---- transformer encoder layers (static unroll, weights stacked on axis 0)
    for l in range(NLAYERS):
        h = _layer_norm(x, ln1w_ref[l], ln1b_ref[l])

        # fused QKV projection: (BS, D) @ (D, 3D)
        qkv = jnp.dot(_bf16(h), wqkv_ref[l],
                      preferred_element_type=jnp.float32) + bqkv_ref[l]
        q = qkv[:, 0:D] * scale
        k = qkv[:, D:2 * D]
        v = qkv[:, 2 * D:3 * D]

        ctxs = []
        for hidx in range(NH):
            lo, hi = hidx * HD, (hidx + 1) * HD
            # scores = qh @ kh^T without materializing a transpose
            scores = jax.lax.dot_general(
                _bf16(q[:, lo:hi]), _bf16(k[:, lo:hi]),
                (((1,), (1,)), ((), ())),
                preferred_element_type=jnp.float32)       # (BS, BS)
            scores = scores + mask                        # block-diag batch mask
            scores = scores - jnp.max(scores, axis=-1, keepdims=True)
            e = jnp.exp(scores)
            p = e * pl.reciprocal(jnp.sum(e, axis=-1, keepdims=True),
                                  approx=True)
            ctxs.append(jnp.dot(_bf16(p), _bf16(v[:, lo:hi]),
                                preferred_element_type=jnp.float32))
        ctx = jnp.concatenate(ctxs, axis=-1)              # (BS, D)

        attn = jnp.dot(_bf16(ctx), wo_ref[l],
                       preferred_element_type=jnp.float32) + bo_ref[l]
        x = x + attn                                      # residual 1

        h2 = _layer_norm(x, ln2w_ref[l], ln2b_ref[l])
        m = jnp.dot(_bf16(h2), w1_ref[l],
                    preferred_element_type=jnp.float32) + b1_ref[l]
        # TODO(synk): HF ViT uses exact erf-GELU; tanh approximation used here.
        m = jax.nn.gelu(m, approximate=True)
        m = jnp.dot(_bf16(m), w2_ref[l],
                    preferred_element_type=jnp.float32) + b2_ref[l]
        x = x + m                                         # residual 2

    # ---- final LayerNorm on CLS rows + regression head ----
    cls_h = jnp.concatenate([x[b * S:b * S + 1, :] for b in range(B)], axis=0)
    hcls = _layer_norm(cls_h, lnw_ref[...], lnb_ref[...])           # (B, D)
    h1 = jnp.maximum(
        jnp.dot(_bf16(hcls), hw1_ref[...],
                preferred_element_type=jnp.float32) + hb1_ref[...], 0.0)
    h2o = jnp.maximum(
        jnp.dot(_bf16(h1), hw2_ref[...],
                preferred_element_type=jnp.float32) + hb2_ref[...], 0.0)
    out_ref[...] = (jnp.dot(_bf16(h2o), hw3_ref[...],
                            preferred_element_type=jnp.float32) + hb3_ref[...])


# ------------------------------ pallas wrapper -------------------------------
def im2col(x):
    # x: (B, C, H, W) -> (B*NPATCH, C*P*P); patch order row-major over (nh, nw);
    # within-patch flatten order (c, ph, pw) to match a flattened Conv2d weight.
    nh = IMG // PATCH
    xr = x.reshape(B, C, nh, PATCH, nh, PATCH)
    xr = jnp.transpose(xr, (0, 2, 4, 1, 3, 5))            # (B, nh, nw, C, P, P)
    return xr.reshape(B * nh * nh, CP2)


def _block_diag_mask():
    ids = jnp.arange(BS) // S
    return jnp.where(ids[:, None] == ids[None, :], 0.0, -1e30).astype(jnp.float32)


def vit_regression_forward(packed, x, zero_out_layer=None, zero_out_head=None):
    # NOTE: the reference PyTorch code zeroes head weights AFTER running the
    # ViT, so the ablation never affects the value returned by that forward
    # call; the args are accepted for signature parity only.
    del zero_out_layer, zero_out_head
    patches = im2col(x)                                   # (B*NPATCH, CP2)
    mask = _block_diag_mask()                             # (BS, BS), constant

    args = [
        patches, mask,
        packed["pw"], packed["pb"], packed["cls"], packed["pos"],
        packed["ln1w"], packed["ln1b"], packed["wqkv"], packed["bqkv"],
        packed["wo"], packed["bo"], packed["ln2w"], packed["ln2b"],
        packed["w1"], packed["b1"], packed["w2"], packed["b2"],
        packed["lnw"], packed["lnb"],
        packed["hw1"], packed["hb1"], packed["hw2"], packed["hb2"],
        packed["hw3"], packed["hb3"],
    ]
    # Single fused kernel, no grid: every array (weights + activations, well
    # under 1 MiB total) is mapped whole into VMEM.
    # TODO(synk): on v7x a grid=(2,) parallel batch axis could use the 2nd
    # TensorCore; kept single-step for v5e/v6e simplicity.
    return pl.pallas_call(
        fused_vit_kernel,
        out_shape=jax.ShapeDtypeStruct((B, 3), jnp.float32),
    )(*args)


# ------------------------------ parameter setup ------------------------------
def init_params(key):
    keys = iter(jax.random.split(key, 128))

    def rnd(shape, scale=0.02):
        return scale * jax.random.normal(next(keys), shape, jnp.float32)

    def zeros(shape):
        return jnp.zeros(shape, jnp.float32)

    def ones(shape):
        return jnp.ones(shape, jnp.float32)

    params = {
        "patch_w": rnd((CP2, D)),
        "patch_b": zeros((1, D)),
        "cls": rnd((1, D)),
        "pos": rnd((S, D)),
        # final ViT LayerNorm
        "lnw": ones((1, D)),
        "lnb": zeros((1, D)),
        # regression head: D -> 256 -> 128 -> 3
        "hw1": rnd((D, 256)), "hb1": zeros((1, 256)),
        "hw2": rnd((256, 128)), "hb2": zeros((1, 128)),
        "hw3": rnd((128, 3)), "hb3": zeros((1, 3)),
        "layers": [],
    }

    scaling = LORA_ALPHA / LORA_R
    for _ in range(NLAYERS):
        wq = rnd((D, D))
        wv = rnd((D, D))
        # LoRA adapters on query & value, folded into effective weights
        # (nonzero B chosen so the LoRA path actually contributes here).
        la_q, lb_q = rnd((D, LORA_R), 0.1), rnd((LORA_R, D), 0.1)
        la_v, lb_v = rnd((D, LORA_R), 0.1), rnd((LORA_R, D), 0.1)
        wq_eff = wq + scaling * (la_q @ lb_q)
        wv_eff = wv + scaling * (la_v @ lb_v)
        params["layers"].append({
            "ln1w": ones((1, D)), "ln1b": zeros((1, D)),
            "wq": wq_eff, "bq": zeros((1, D)),
            "wk": rnd((D, D)), "bk": zeros((1, D)),
            "wv": wv_eff, "bv": zeros((1, D)),
            "wo": rnd((D, D)), "bo": zeros((1, D)),
            "ln2w": ones((1, D)), "ln2b": zeros((1, D)),
            "w1": rnd((D, MLP)), "b1": zeros((1, MLP)),
            "w2": rnd((MLP, D)), "b2": zeros((1, D)),
        })
    return params


def pack_params(params):
    """Fold QKV into one matrix, stack per-layer weights, cast matmul operands
    to bf16 (biases / LayerNorm params stay f32)."""
    layers = params["layers"]

    def stack(name):
        return jnp.stack([l[name] for l in layers], axis=0)

    wqkv = jnp.stack(
        [jnp.concatenate([l["wq"], l["wk"], l["wv"]], axis=1) for l in layers], 0)
    bqkv = jnp.stack(
        [jnp.concatenate([l["bq"], l["bk"], l["bv"]], axis=1) for l in layers], 0)

    bf16 = lambda a: a.astype(jnp.bfloat16)
    return {
        "pw": bf16(params["patch_w"]), "pb": params["patch_b"],
        "cls": params["cls"], "pos": params["pos"],
        "ln1w": stack("ln1w"), "ln1b": stack("ln1b"),
        "wqkv": bf16(wqkv), "bqkv": bqkv,
        "wo": bf16(stack("wo")), "bo": stack("bo"),
        "ln2w": stack("ln2w"), "ln2b": stack("ln2b"),
        "w1": bf16(stack("w1")), "b1": stack("b1"),
        "w2": bf16(stack("w2")), "b2": stack("b2"),
        "lnw": params["lnw"], "lnb": params["lnb"],
        "hw1": bf16(params["hw1"]), "hb1": params["hb1"],
        "hw2": bf16(params["hw2"]), "hb2": params["hb2"],
        "hw3": bf16(params["hw3"]), "hb3": params["hb3"],
    }


if __name__ == "__main__":
    x = jax.random.normal(jax.random.PRNGKey(0), (B, C, IMG, IMG), jnp.float32)
    params = init_params(jax.random.PRNGKey(1))
    packed = pack_params(params)

    fwd = jax.jit(lambda inp: vit_regression_forward(packed, inp))
    out = jax.block_until_ready(fwd(x))
    assert out.shape == (B, 3) and out.dtype == jnp.float32
    assert bool(jnp.all(jnp.isfinite(out)))
    print("KERNEL_OK")
</pallas_src>

<mosaic_0001>
module attributes {stable_mosaic.version = 11 : i64} {
  func.func @fused_vit_kernel(%arg0: memref<8x192xf32, #tpu.memory_space<vmem>>, %arg1: memref<10x10xf32, #tpu.memory_space<vmem>>, %arg2: memref<192x32xbf16, #tpu.memory_space<vmem>>, %arg3: memref<1x32xf32, #tpu.memory_space<vmem>>, %arg4: memref<1x32xf32, #tpu.memory_space<vmem>>, %arg5: memref<5x32xf32, #tpu.memory_space<vmem>>, %arg6: memref<2x1x32xf32, #tpu.memory_space<vmem>>, %arg7: memref<2x1x32xf32, #tpu.memory_space<vmem>>, %arg8: memref<2x32x96xbf16, #tpu.memory_space<vmem>>, %arg9: memref<2x1x96xf32, #tpu.memory_space<vmem>>, %arg10: memref<2x32x32xbf16, #tpu.memory_space<vmem>>, %arg11: memref<2x1x32xf32, #tpu.memory_space<vmem>>, %arg12: memref<2x1x32xf32, #tpu.memory_space<vmem>>, %arg13: memref<2x1x32xf32, #tpu.memory_space<vmem>>, %arg14: memref<2x32x128xbf16, #tpu.memory_space<vmem>>, %arg15: memref<2x1x128xf32, #tpu.memory_space<vmem>>, %arg16: memref<2x128x32xbf16, #tpu.memory_space<vmem>>, %arg17: memref<2x1x32xf32, #tpu.memory_space<vmem>>, %arg18: memref<1x32xf32, #tpu.memory_space<vmem>>, %arg19: memref<1x32xf32, #tpu.memory_space<vmem>>, %arg20: memref<32x256xbf16, #tpu.memory_space<vmem>>, %arg21: memref<1x256xf32, #tpu.memory_space<vmem>>, %arg22: memref<256x128xbf16, #tpu.memory_space<vmem>>, %arg23: memref<1x128xf32, #tpu.memory_space<vmem>>, %arg24: memref<128x3xbf16, #tpu.memory_space<vmem>>, %arg25: memref<1x3xf32, #tpu.memory_space<vmem>>, %arg26: memref<2x3xf32, #tpu.memory_space<vmem>>) attributes {dimension_semantics = [], scalar_prefetch = 0 : i64, scratch_operands = 0 : i64, tpu.core_type = #tpu.core_type<tc>} {
    %c0 = arith.constant 0 : index
    %c0_0 = arith.constant 0 : index
    %0 = vector.load %arg0[%c0, %c0_0] : memref<8x192xf32, #tpu.memory_space<vmem>>, vector<8x192xf32>
    %1 = arith.truncf %0 : vector<8x192xf32> to vector<8x192xbf16>
    %c0_1 = arith.constant 0 : index
    %c0_2 = arith.constant 0 : index
    %2 = vector.load %arg2[%c0_1, %c0_2] : memref<192x32xbf16, #tpu.memory_space<vmem>>, vector<192x32xbf16>
    %cst = arith.constant dense<0.000000e+00> : vector<8x32xf32>
    %3 = tpu.matmul %1, %2, %cst {dimension_numbers = #tpu.dot_dimension_numbers<[1], [0], [0], [1], [0, 0, 1, 1], [], []>} : vector<8x192xbf16>, vector<192x32xbf16>, vector<8x32xf32> -> vector<8x32xf32>
    %c0_3 = arith.constant 0 : index
    %c0_4 = arith.constant 0 : index
    %4 = vector.load %arg3[%c0_3, %c0_4] : memref<1x32xf32, #tpu.memory_space<vmem>>, vector<1x32xf32>
    %5 = vector.broadcast %4 : vector<1x32xf32> to vector<8x32xf32>
    %6 = arith.addf %3, %5 : vector<8x32xf32>
    %c0_5 = arith.constant 0 : index
    %c0_6 = arith.constant 0 : index
    %7 = vector.load %arg5[%c0_5, %c0_6] : memref<5x32xf32, #tpu.memory_space<vmem>>, vector<5x32xf32>
    %c0_7 = arith.constant 0 : index
    %c0_8 = arith.constant 0 : index
    %8 = vector.load %arg4[%c0_7, %c0_8] : memref<1x32xf32, #tpu.memory_space<vmem>>, vector<1x32xf32>
    %9 = vector.extract_strided_slice %7 {offsets = [0, 0], sizes = [1, 32], strides = [1, 1]} : vector<5x32xf32> to vector<1x32xf32>
    %10 = arith.addf %8, %9 : vector<1x32xf32>
    %11 = vector.extract_strided_slice %6 {offsets = [0, 0], sizes = [4, 32], strides = [1, 1]} : vector<8x32xf32> to vector<4x32xf32>
    %12 = vector.extract_strided_slice %7 {offsets = [1, 0], sizes = [4, 32], strides = [1, 1]} : vector<5x32xf32> to vector<4x32xf32>
    %13 = arith.addf %11, %12 : vector<4x32xf32>
    %14 = vector.extract_strided_slice %6 {offsets = [4, 0], sizes = [4, 32], strides = [1, 1]} : vector<8x32xf32> to vector<4x32xf32>
    %15 = vector.extract_strided_slice %7 {offsets = [1, 0], sizes = [4, 32], strides = [1, 1]} : vector<5x32xf32> to vector<4x32xf32>
    %16 = arith.addf %14, %15 : vector<4x32xf32>
    %17 = tpu.concatenate %10, %13, %10, %16 in 0 : vector<1x32xf32>, vector<4x32xf32>, vector<1x32xf32>, vector<4x32xf32> -> vector<10x32xf32>
    %c0_9 = arith.constant 0 : index
    %c0_10 = arith.constant 0 : index
    %18 = vector.load %arg1[%c0_9, %c0_10] : memref<10x10xf32, #tpu.memory_space<vmem>>, vector<10x10xf32>
    %c0_11 = arith.constant 0 : index
    %c0_12 = arith.constant 0 : index
    %c0_13 = arith.constant 0 : index
    %19 = vector.load %arg6[%c0_11, %c0_12, %c0_13] : memref<2x1x32xf32, #tpu.memory_space<vmem>>, vector<1x1x32xf32>
    %20 = vector.shape_cast %19 : vector<1x1x32xf32> to vector<1x32xf32>
    %c0_14 = arith.constant 0 : index
    %c0_15 = arith.constant 0 : index
    %c0_16 = arith.constant 0 : index
    %21 = vector.load %arg7[%c0_14, %c0_15, %c0_16] : memref<2x1x32xf32, #tpu.memory_space<vmem>>, vector<1x1x32xf32>
    %22 = vector.shape_cast %21 : vector<1x1x32xf32> to vector<1x32xf32>
    %cst_17 = arith.constant dense<0.000000e+00> : vector<10xf32>
    %23 = vector.multi_reduction <add>, %17, %cst_17 [1] : vector<10x32xf32> to vector<10xf32>
    %24 = vector.shape_cast %23 : vector<10xf32> to vector<10x1xf32>
    %cst_18 = arith.constant 3.200000e+01 : f32
    %25 = vector.broadcast %cst_18 : f32 to vector<10x1xf32>
    %26 = arith.divf %24, %25 : vector<10x1xf32>
    %27 = vector.broadcast %26 : vector<10x1xf32> to vector<10x32xf32>
    %28 = arith.subf %17, %27 : vector<10x32xf32>
    %29 = arith.mulf %28, %28 : vector<10x32xf32>
    %cst_19 = arith.constant dense<0.000000e+00> : vector<10xf32>
    %30 = vector.multi_reduction <add>, %29, %cst_19 [1] : vector<10x32xf32> to vector<10xf32>
    %31 = vector.shape_cast %30 : vector<10xf32> to vector<10x1xf32>
    %cst_20 = arith.constant 3.200000e+01 : f32
    %32 = vector.broadcast %cst_20 : f32 to vector<10x1xf32>
    %33 = arith.divf %31, %32 : vector<10x1xf32>
    %34 = vector.broadcast %26 : vector<10x1xf32> to vector<10x32xf32>
    %35 = arith.subf %17, %34 : vector<10x32xf32>
    %cst_21 = arith.constant 9.99999996E-13 : f32
    %36 = vector.broadcast %cst_21 : f32 to vector<10x1xf32>
    %37 = arith.addf %33, %36 : vector<10x1xf32>
    %38 = math.rsqrt %37 : vector<10x1xf32>
    %39 = vector.broadcast %38 : vector<10x1xf32> to vector<10x32xf32>
    %40 = arith.mulf %35, %39 : vector<10x32xf32>
    %41 = vector.broadcast %20 : vector<1x32xf32> to vector<10x32xf32>
    %42 = arith.mulf %40, %41 : vector<10x32xf32>
    %43 = vector.broadcast %22 : vector<1x32xf32> to vector<10x32xf32>
    %44 = arith.addf %42, %43 : vector<10x32xf32>
    %45 = arith.truncf %44 : vector<10x32xf32> to vector<10x32xbf16>
    %c0_22 = arith.constant 0 : index
    %c0_23 = arith.constant 0 : index
    %c0_24 = arith.constant 0 : index
    %46 = vector.load %arg8[%c0_22, %c0_23, %c0_24] : memref<2x32x96xbf16, #tpu.memory_space<vmem>>, vector<1x32x96xbf16>
    %47 = vector.shape_cast %46 : vector<1x32x96xbf16> to vector<32x96xbf16>
    %cst_25 = arith.constant dense<0.000000e+00> : vector<10x96xf32>
    %48 = tpu.matmul %45, %47, %cst_25 {dimension_numbers = #tpu.dot_dimension_numbers<[1], [0], [0], [1], [0, 0, 1, 1], [], []>} : vector<10x32xbf16>, vector<32x96xbf16>, vector<10x96xf32> -> vector<10x96xf32>
    %c0_26 = arith.constant 0 : index
    %c0_27 = arith.constant 0 : index
    %c0_28 = arith.constant 0 : index
    %49 = vector.load %arg9[%c0_26, %c0_27, %c0_28] : memref<2x1x96xf32, #tpu.memory_space<vmem>>, vector<1x1x96xf32>
    %50 = vector.shape_cast %49 : vector<1x1x96xf32> to vector<1x96xf32>
    %51 = vector.broadcast %50 : vector<1x96xf32> to vector<10x96xf32>
    %52 = arith.addf %48, %51 : vector<10x96xf32>
    %53 = vector.extract_strided_slice %52 {offsets = [0, 0], sizes = [10, 32], strides = [1, 1]} : vector<10x96xf32> to vector<10x32xf32>
    %cst_29 = arith.constant 0.353553385 : f32
    %54 = vector.broadcast %cst_29 : f32 to vector<10x32xf32>
    %55 = arith.mulf %53, %54 : vector<10x32xf32>
    %56 = vector.extract_strided_slice %52 {offsets = [0, 32], sizes = [10, 32], strides = [1, 1]} : vector<10x96xf32> to vector<10x32xf32>
    %57 = vector.extract_strided_slice %52 {offsets = [0, 64], sizes = [10, 32], strides = [1, 1]} : vector<10x96xf32> to vector<10x32xf32>
    %58 = vector.extract_strided_slice %55 {offsets = [0, 0], sizes = [10, 8], strides = [1, 1]} : vector<10x32xf32> to vector<10x8xf32>
    %59 = arith.truncf %58 : vector<10x8xf32> to vector<10x8xbf16>
    %60 = vector.extract_strided_slice %56 {offsets = [0, 0], sizes = [10, 8], strides = [1, 1]} : vector<10x32xf32> to vector<10x8xf32>
    %61 = arith.truncf %60 : vector<10x8xf32> to vector<10x8xbf16>
    %cst_30 = arith.constant dense<0.000000e+00> : vector<10x10xf32>
    %62 = tpu.matmul %59, %61, %cst_30 {dimension_numbers = #tpu.dot_dimension_numbers<[1], [1], [0], [0], [0, 0, 1, 0], [], []>} : vector<10x8xbf16>, vector<10x8xbf16>, vector<10x10xf32> -> vector<10x10xf32>
    %63 = arith.addf %62, %18 : vector<10x10xf32>
    %cst_31 = arith.constant dense<0xFF800000> : vector<10xf32>
    %64 = vector.multi_reduction <maximumf>, %63, %cst_31 [1] : vector<10x10xf32> to vector<10xf32>
    %65 = vector.shape_cast %64 : vector<10xf32> to vector<10x1xf32>
    %66 = vector.broadcast %65 : vector<10x1xf32> to vector<10x10xf32>
    %67 = arith.subf %63, %66 : vector<10x10xf32>
    %68 = math.exp %67 : vector<10x10xf32>
    %cst_32 = arith.constant dense<0.000000e+00> : vector<10xf32>
    %69 = vector.multi_reduction <add>, %68, %cst_32 [1] : vector<10x10xf32> to vector<10xf32>
    %70 = vector.shape_cast %69 : vector<10xf32> to vector<10x1xf32>
    %71 = tpu.reciprocal %70 {approx = true} : vector<10x1xf32> -> vector<10x1xf32>
    %72 = vector.broadcast %71 : vector<10x1xf32> to vector<10x10xf32>
    %73 = arith.mulf %68, %72 : vector<10x10xf32>
    %74 = arith.truncf %73 : vector<10x10xf32> to vector<10x10xbf16>
    %75 = vector.extract_strided_slice %57 {offsets = [0, 0], sizes = [10, 8], strides = [1, 1]} : vector<10x32xf32> to vector<10x8xf32>
    %76 = arith.truncf %75 : vector<10x8xf32> to vector<10x8xbf16>
    %cst_33 = arith.constant dense<0.000000e+00> : vector<10x8xf32>
    %77 = tpu.matmul %74, %76, %cst_33 {dimension_numbers = #tpu.dot_dimension_numbers<[1], [0], [0], [1], [0, 0, 1, 1], [], []>} : vector<10x10xbf16>, vector<10x8xbf16>, vector<10x8xf32> -> vector<10x8xf32>
    %78 = vector.extract_strided_slice %55 {offsets = [0, 8], sizes = [10, 8], strides = [1, 1]} : vector<10x32xf32> to vector<10x8xf32>
    %79 = arith.truncf %78 : vector<10x8xf32> to vector<10x8xbf16>
    %80 = vector.extract_strided_slice %56 {offsets = [0, 8], sizes = [10, 8], strides = [1, 1]} : vector<10x32xf32> to vector<10x8xf32>
    %81 = arith.truncf %80 : vector<10x8xf32> to vector<10x8xbf16>
    %cst_34 = arith.constant dense<0.000000e+00> : vector<10x10xf32>
    %82 = tpu.matmul %79, %81, %cst_34 {dimension_numbers = #tpu.dot_dimension_numbers<[1], [1], [0], [0], [0, 0, 1, 0], [], []>} : vector<10x8xbf16>, vector<10x8xbf16>, vector<10x10xf32> -> vector<10x10xf32>
    %83 = arith.addf %82, %18 : vector<10x10xf32>
    %cst_35 = arith.constant dense<0xFF800000> : vector<10xf32>
    %84 = vector.multi_reduction <maximumf>, %83, %cst_35 [1] : vector<10x10xf32> to vector<10xf32>
    %85 = vector.shape_cast %84 : vector<10xf32> to vector<10x1xf32>
    %86 = vector.broadcast %85 : vector<10x1xf32> to vector<10x10xf32>
    %87 = arith.subf %83, %86 : vector<10x10xf32>
    %88 = math.exp %87 : vector<10x10xf32>
    %cst_36 = arith.constant dense<0.000000e+00> : vector<10xf32>
    %89 = vector.multi_reduction <add>, %88, %cst_36 [1] : vector<10x10xf32> to vector<10xf32>
    %90 = vector.shape_cast %89 : vector<10xf32> to vector<10x1xf32>
    %91 = tpu.reciprocal %90 {approx = true} : vector<10x1xf32> -> vector<10x1xf32>
    %92 = vector.broadcast %91 : vector<10x1xf32> to vector<10x10xf32>
    %93 = arith.mulf %88, %92 : vector<10x10xf32>
    %94 = arith.truncf %93 : vector<10x10xf32> to vector<10x10xbf16>
    %95 = vector.extract_strided_slice %57 {offsets = [0, 8], sizes = [10, 8], strides = [1, 1]} : vector<10x32xf32> to vector<10x8xf32>
    %96 = arith.truncf %95 : vector<10x8xf32> to vector<10x8xbf16>
    %cst_37 = arith.constant dense<0.000000e+00> : vector<10x8xf32>
    %97 = tpu.matmul %94, %96, %cst_37 {dimension_numbers = #tpu.dot_dimension_numbers<[1], [0], [0], [1], [0, 0, 1, 1], [], []>} : vector<10x10xbf16>, vector<10x8xbf16>, vector<10x8xf32> -> vector<10x8xf32>
    %98 = vector.extract_strided_slice %55 {offsets = [0, 16], sizes = [10, 8], strides = [1, 1]} : vector<10x32xf32> to vector<10x8xf32>
    %99 = arith.truncf %98 : vector<10x8xf32> to vector<10x8xbf16>
    %100 = vector.extract_strided_slice %56 {offsets = [0, 16], sizes = [10, 8], strides = [1, 1]} : vector<10x32xf32> to vector<10x8xf32>
    %101 = arith.truncf %100 : vector<10x8xf32> to vector<10x8xbf16>
    %cst_38 = arith.constant dense<0.000000e+00> : vector<10x10xf32>
    %102 = tpu.matmul %99, %101, %cst_38 {dimension_numbers = #tpu.dot_dimension_numbers<[1], [1], [0], [0], [0, 0, 1, 0], [], []>} : vector<10x8xbf16>, vector<10x8xbf16>, vector<10x10xf32> -> vector<10x10xf32>
    %103 = arith.addf %102, %18 : vector<10x10xf32>
    %cst_39 = arith.constant dense<0xFF800000> : vector<10xf32>
    %104 = vector.multi_reduction <maximumf>, %103, %cst_39 [1] : vector<10x10xf32> to vector<10xf32>
    %105 = vector.shape_cast %104 : vector<10xf32> to vector<10x1xf32>
    %106 = vector.broadcast %105 : vector<10x1xf32> to vector<10x10xf32>
    %107 = arith.subf %103, %106 : vector<10x10xf32>
    %108 = math.exp %107 : vector<10x10xf32>
    %cst_40 = arith.constant dense<0.000000e+00> : vector<10xf32>
    %109 = vector.multi_reduction <add>, %108, %cst_40 [1] : vector<10x10xf32> to vector<10xf32>
    %110 = vector.shape_cast %109 : vector<10xf32> to vector<10x1xf32>
    %111 = tpu.reciprocal %110 {approx = true} : vector<10x1xf32> -> vector<10x1xf32>
    %112 = vector.broadcast %111 : vector<10x1xf32> to vector<10x10xf32>
    %113 = arith.mulf %108, %112 : vector<10x10xf32>
    %114 = arith.truncf %113 : vector<10x10xf32> to vector<10x10xbf16>
    %115 = vector.extract_strided_slice %57 {offsets = [0, 16], sizes = [10, 8], strides = [1, 1]} : vector<10x32xf32> to vector<10x8xf32>
    %116 = arith.truncf %115 : vector<10x8xf32> to vector<10x8xbf16>
    %cst_41 = arith.constant dense<0.000000e+00> : vector<10x8xf32>
    %117 = tpu.matmul %114, %116, %cst_41 {dimension_numbers = #tpu.dot_dimension_numbers<[1], [0], [0], [1], [0, 0, 1, 1], [], []>} : vector<10x10xbf16>, vector<10x8xbf16>, vector<10x8xf32> -> vector<10x8xf32>
    %118 = vector.extract_strided_slice %55 {offsets = [0, 24], sizes = [10, 8], strides = [1, 1]} : vector<10x32xf32> to vector<10x8xf32>
    %119 = arith.truncf %118 : vector<10x8xf32> to vector<10x8xbf16>
    %120 = vector.extract_strided_slice %56 {offsets = [0, 24], sizes = [10, 8], strides = [1, 1]} : vector<10x32xf32> to vector<10x8xf32>
    %121 = arith.truncf %120 : vector<10x8xf32> to vector<10x8xbf16>
    %cst_42 = arith.constant dense<0.000000e+00> : vector<10x10xf32>
    %122 = tpu.matmul %119, %121, %cst_42 {dimension_numbers = #tpu.dot_dimension_numbers<[1], [1], [0], [0], [0, 0, 1, 0], [], []>} : vector<10x8xbf16>, vector<10x8xbf16>, vector<10x10xf32> -> vector<10x10xf32>
    %123 = arith.addf %122, %18 : vector<10x10xf32>
    %cst_43 = arith.constant dense<0xFF800000> : vector<10xf32>
    %124 = vector.multi_reduction <maximumf>, %123, %cst_43 [1] : vector<10x10xf32> to vector<10xf32>
    %125 = vector.shape_cast %124 : vector<10xf32> to vector<10x1xf32>
    %126 = vector.broadcast %125 : vector<10x1xf32> to vector<10x10xf32>
    %127 = arith.subf %123, %126 : vector<10x10xf32>
    %128 = math.exp %127 : vector<10x10xf32>
    %cst_44 = arith.constant dense<0.000000e+00> : vector<10xf32>
    %129 = vector.multi_reduction <add>, %128, %cst_44 [1] : vector<10x10xf32> to vector<10xf32>
    %130 = vector.shape_cast %129 : vector<10xf32> to vector<10x1xf32>
    %131 = tpu.reciprocal %130 {approx = true} : vector<10x1xf32> -> vector<10x1xf32>
    %132 = vector.broadcast %131 : vector<10x1xf32> to vector<10x10xf32>
    %133 = arith.mulf %128, %132 : vector<10x10xf32>
    %134 = arith.truncf %133 : vector<10x10xf32> to vector<10x10xbf16>
    %135 = vector.extract_strided_slice %57 {offsets = [0, 24], sizes = [10, 8], strides = [1, 1]} : vector<10x32xf32> to vector<10x8xf32>
    %136 = arith.truncf %135 : vector<10x8xf32> to vector<10x8xbf16>
    %cst_45 = arith.constant dense<0.000000e+00> : vector<10x8xf32>
    %137 = tpu.matmul %134, %136, %cst_45 {dimension_numbers = #tpu.dot_dimension_numbers<[1], [0], [0], [1], [0, 0, 1, 1], [], []>} : vector<10x10xbf16>, vector<10x8xbf16>, vector<10x8xf32> -> vector<10x8xf32>
    %138 = tpu.concatenate %77, %97, %117, %137 in 1 : vector<10x8xf32>, vector<10x8xf32>, vector<10x8xf32>, vector<10x8xf32> -> vector<10x32xf32>
    %139 = arith.truncf %138 : vector<10x32xf32> to vector<10x32xbf16>
    %c0_46 = arith.constant 0 : index
    %c0_47 = arith.constant 0 : index
    %c0_48 = arith.constant 0 : index
    %140 = vector.load %arg10[%c0_46, %c0_47, %c0_48] : memref<2x32x32xbf16, #tpu.memory_space<vmem>>, vector<1x32x32xbf16>
    %141 = vector.shape_cast %140 : vector<1x32x32xbf16> to vector<32x32xbf16>
    %cst_49 = arith.constant dense<0.000000e+00> : vector<10x32xf32>
    %142 = tpu.matmul %139, %141, %cst_49 {dimension_numbers = #tpu.dot_dimension_numbers<[1], [0], [0], [1], [0, 0, 1, 1], [], []>} : vector<10x32xbf16>, vector<32x32xbf16>, vector<10x32xf32> -> vector<10x32xf32>
    %c0_50 = arith.constant 0 : index
    %c0_51 = arith.constant 0 : index
    %c0_52 = arith.constant 0 : index
    %143 = vector.load %arg11[%c0_50, %c0_51, %c0_52] : memref<2x1x32xf32, #tpu.memory_space<vmem>>, vector<1x1x32xf32>
    %144 = vector.shape_cast %143 : vector<1x1x32xf32> to vector<1x32xf32>
    %145 = vector.broadcast %144 : vector<1x32xf32> to vector<10x32xf32>
    %146 = arith.addf %142, %145 : vector<10x32xf32>
    %147 = arith.addf %17, %146 : vector<10x32xf32>
    %c0_53 = arith.constant 0 : index
    %c0_54 = arith.constant 0 : index
    %c0_55 = arith.constant 0 : index
    %148 = vector.load %arg12[%c0_53, %c0_54, %c0_55] : memref<2x1x32xf32, #tpu.memory_space<vmem>>, vector<1x1x32xf32>
    %149 = vector.shape_cast %148 : vector<1x1x32xf32> to vector<1x32xf32>
    %c0_56 = arith.constant 0 : index
    %c0_57 = arith.constant 0 : index
    %c0_58 = arith.constant 0 : index
    %150 = vector.load %arg13[%c0_56, %c0_57, %c0_58] : memref<2x1x32xf32, #tpu.memory_space<vmem>>, vector<1x1x32xf32>
    %151 = vector.shape_cast %150 : vector<1x1x32xf32> to vector<1x32xf32>
    %cst_59 = arith.constant dense<0.000000e+00> : vector<10xf32>
    %152 = vector.multi_reduction <add>, %147, %cst_59 [1] : vector<10x32xf32> to vector<10xf32>
    %153 = vector.shape_cast %152 : vector<10xf32> to vector<10x1xf32>
    %cst_60 = arith.constant 3.200000e+01 : f32
    %154 = vector.broadcast %cst_60 : f32 to vector<10x1xf32>
    %155 = arith.divf %153, %154 : vector<10x1xf32>
    %156 = vector.broadcast %155 : vector<10x1xf32> to vector<10x32xf32>
    %157 = arith.subf %147, %156 : vector<10x32xf32>
    %158 = arith.mulf %157, %157 : vector<10x32xf32>
    %cst_61 = arith.constant dense<0.000000e+00> : vector<10xf32>
    %159 = vector.multi_reduction <add>, %158, %cst_61 [1] : vector<10x32xf32> to vector<10xf32>
    %160 = vector.shape_cast %159 : vector<10xf32> to vector<10x1xf32>
    %cst_62 = arith.constant 3.200000e+01 : f32
    %161 = vector.broadcast %cst_62 : f32 to vector<10x1xf32>
    %162 = arith.divf %160, %161 : vector<10x1xf32>
    %163 = vector.broadcast %155 : vector<10x1xf32> to vector<10x32xf32>
    %164 = arith.subf %147, %163 : vector<10x32xf32>
    %cst_63 = arith.constant 9.99999996E-13 : f32
    %165 = vector.broadcast %cst_63 : f32 to vector<10x1xf32>
    %166 = arith.addf %162, %165 : vector<10x1xf32>
    %167 = math.rsqrt %166 : vector<10x1xf32>
    %168 = vector.broadcast %167 : vector<10x1xf32> to vector<10x32xf32>
    %169 = arith.mulf %164, %168 : vector<10x32xf32>
    %170 = vector.broadcast %149 : vector<1x32xf32> to vector<10x32xf32>
    %171 = arith.mulf %169, %170 : vector<10x32xf32>
    %172 = vector.broadcast %151 : vector<1x32xf32> to vector<10x32xf32>
    %173 = arith.addf %171, %172 : vector<10x32xf32>
    %174 = arith.truncf %173 : vector<10x32xf32> to vector<10x32xbf16>
    %c0_64 = arith.constant 0 : index
    %c0_65 = arith.constant 0 : index
    %c0_66 = arith.constant 0 : index
    %175 = vector.load %arg14[%c0_64, %c0_65, %c0_66] : memref<2x32x128xbf16, #tpu.memory_space<vmem>>, vector<1x32x128xbf16>
    %176 = vector.shape_cast %175 : vector<1x32x128xbf16> to vector<32x128xbf16>
    %cst_67 = arith.constant dense<0.000000e+00> : vector<10x128xf32>
    %177 = tpu.matmul %174, %176, %cst_67 {dimension_numbers = #tpu.dot_dimension_numbers<[1], [0], [0], [1], [0, 0, 1, 1], [], []>} : vector<10x32xbf16>, vector<32x128xbf16>, vector<10x128xf32> -> vector<10x128xf32>
    %c0_68 = arith.constant 0 : index
    %c0_69 = arith.constant 0 : index
    %c0_70 = arith.constant 0 : index
    %178 = vector.load %arg15[%c0_68, %c0_69, %c0_70] : memref<2x1x128xf32, #tpu.memory_space<vmem>>, vector<1x1x128xf32>
    %179 = vector.shape_cast %178 : vector<1x1x128xf32> to vector<1x128xf32>
    %180 = vector.broadcast %179 : vector<1x128xf32> to vector<10x128xf32>
    %181 = arith.addf %177, %180 : vector<10x128xf32>
    %182 = arith.mulf %181, %181 : vector<10x128xf32>
    %183 = arith.mulf %181, %182 : vector<10x128xf32>
    %cst_71 = arith.constant 4.471500e-02 : f32
    %184 = vector.broadcast %cst_71 : f32 to vector<10x128xf32>
    %185 = arith.mulf %184, %183 : vector<10x128xf32>
    %186 = arith.addf %181, %185 : vector<10x128xf32>
    %cst_72 = arith.constant 0.797884583 : f32
    %187 = vector.broadcast %cst_72 : f32 to vector<10x128xf32>
    %188 = arith.mulf %187, %186 : vector<10x128xf32>
    %189 = math.tanh %188 : vector<10x128xf32>
    %cst_73 = arith.constant 1.000000e+00 : f32
    %190 = vector.broadcast %cst_73 : f32 to vector<10x128xf32>
    %191 = arith.addf %190, %189 : vector<10x128xf32>
    %cst_74 = arith.constant 5.000000e-01 : f32
    %192 = vector.broadcast %cst_74 : f32 to vector<10x128xf32>
    %193 = arith.mulf %192, %191 : vector<10x128xf32>
    %194 = arith.mulf %181, %193 : vector<10x128xf32>
    %195 = arith.truncf %194 : vector<10x128xf32> to vector<10x128xbf16>
    %c0_75 = arith.constant 0 : index
    %c0_76 = arith.constant 0 : index
    %c0_77 = arith.constant 0 : index
    %196 = vector.load %arg16[%c0_75, %c0_76, %c0_77] : memref<2x128x32xbf16, #tpu.memory_space<vmem>>, vector<1x128x32xbf16>
    %197 = vector.shape_cast %196 : vector<1x128x32xbf16> to vector<128x32xbf16>
    %cst_78 = arith.constant dense<0.000000e+00> : vector<10x32xf32>
    %198 = tpu.matmul %195, %197, %cst_78 {dimension_numbers = #tpu.dot_dimension_numbers<[1], [0], [0], [1], [0, 0, 1, 1], [], []>} : vector<10x128xbf16>, vector<128x32xbf16>, vector<10x32xf32> -> vector<10x32xf32>
    %c0_79 = arith.constant 0 : index
    %c0_80 = arith.constant 0 : index
    %c0_81 = arith.constant 0 : index
    %199 = vector.load %arg17[%c0_79, %c0_80, %c0_81] : memref<2x1x32xf32, #tpu.memory_space<vmem>>, vector<1x1x32xf32>
    %200 = vector.shape_cast %199 : vector<1x1x32xf32> to vector<1x32xf32>
    %201 = vector.broadcast %200 : vector<1x32xf32> to vector<10x32xf32>
    %202 = arith.addf %198, %201 : vector<10x32xf32>
    %203 = arith.addf %147, %202 : vector<10x32xf32>
    %c1 = arith.constant 1 : index
    %c0_82 = arith.constant 0 : index
    %c0_83 = arith.constant 0 : index
    %204 = vector.load %arg6[%c1, %c0_82, %c0_83] : memref<2x1x32xf32, #tpu.memory_space<vmem>>, vector<1x1x32xf32>
    %205 = vector.shape_cast %204 : vector<1x1x32xf32> to vector<1x32xf32>
    %c1_84 = arith.constant 1 : index
    %c0_85 = arith.constant 0 : index
    %c0_86 = arith.constant 0 : index
    %206 = vector.load %arg7[%c1_84, %c0_85, %c0_86] : memref<2x1x32xf32, #tpu.memory_space<vmem>>, vector<1x1x32xf32>
    %207 = vector.shape_cast %206 : vector<1x1x32xf32> to vector<1x32xf32>
    %cst_87 = arith.constant dense<0.000000e+00> : vector<10xf32>
    %208 = vector.multi_reduction <add>, %203, %cst_87 [1] : vector<10x32xf32> to vector<10xf32>
    %209 = vector.shape_cast %208 : vector<10xf32> to vector<10x1xf32>
    %cst_88 = arith.constant 3.200000e+01 : f32
    %210 = vector.broadcast %cst_88 : f32 to vector<10x1xf32>
    %211 = arith.divf %209, %210 : vector<10x1xf32>
    %212 = vector.broadcast %211 : vector<10x1xf32> to vector<10x32xf32>
    %213 = arith.subf %203, %212 : vector<10x32xf32>
    %214 = arith.mulf %213, %213 : vector<10x32xf32>
    %cst_89 = arith.constant dense<0.000000e+00> : vector<10xf32>
    %215 = vector.multi_reduction <add>, %214, %cst_89 [1] : vector<10x32xf32> to vector<10xf32>
    %216 = vector.shape_cast %215 : vector<10xf32> to vector<10x1xf32>
    %cst_90 = arith.constant 3.200000e+01 : f32
    %217 = vector.broadcast %cst_90 : f32 to vector<10x1xf32>
    %218 = arith.divf %216, %217 : vector<10x1xf32>
    %219 = vector.broadcast %211 : vector<10x1xf32> to vector<10x32xf32>
    %220 = arith.subf %203, %219 : vector<10x32xf32>
    %cst_91 = arith.constant 9.99999996E-13 : f32
    %221 = vector.broadcast %cst_91 : f32 to vector<10x1xf32>
    %222 = arith.addf %218, %221 : vector<10x1xf32>
    %223 = math.rsqrt %222 : vector<10x1xf32>
    %224 = vector.broadcast %223 : vector<10x1xf32> to vector<10x32xf32>
    %225 = arith.mulf %220, %224 : vector<10x32xf32>
    %226 = vector.broadcast %205 : vector<1x32xf32> to vector<10x32xf32>
    %227 = arith.mulf %225, %226 : vector<10x32xf32>
    %228 = vector.broadcast %207 : vector<1x32xf32> to vector<10x32xf32>
    %229 = arith.addf %227, %228 : vector<10x32xf32>
    %230 = arith.truncf %229 : vector<10x32xf32> to vector<10x32xbf16>
    %c1_92 = arith.constant 1 : index
    %c0_93 = arith.constant 0 : index
    %c0_94 = arith.constant 0 : index
    %231 = vector.load %arg8[%c1_92, %c0_93, %c0_94] : memref<2x32x96xbf16, #tpu.memory_space<vmem>>, vector<1x32x96xbf16>
    %232 = vector.shape_cast %231 : vector<1x32x96xbf16> to vector<32x96xbf16>
    %cst_95 = arith.constant dense<0.000000e+00> : vector<10x96xf32>
    %233 = tpu.matmul %230, %232, %cst_95 {dimension_numbers = #tpu.dot_dimension_numbers<[1], [0], [0], [1], [0, 0, 1, 1], [], []>} : vector<10x32xbf16>, vector<32x96xbf16>, vector<10x96xf32> -> vector<10x96xf32>
    %c1_96 = arith.constant 1 : index
    %c0_97 = arith.constant 0 : index
    %c0_98 = arith.constant 0 : index
    %234 = vector.load %arg9[%c1_96, %c0_97, %c0_98] : memref<2x1x96xf32, #tpu.memory_space<vmem>>, vector<1x1x96xf32>
    %235 = vector.shape_cast %234 : vector<1x1x96xf32> to vector<1x96xf32>
    %236 = vector.broadcast %235 : vector<1x96xf32> to vector<10x96xf32>
    %237 = arith.addf %233, %236 : vector<10x96xf32>
    %238 = vector.extract_strided_slice %237 {offsets = [0, 0], sizes = [10, 32], strides = [1, 1]} : vector<10x96xf32> to vector<10x32xf32>
    %cst_99 = arith.constant 0.353553385 : f32
    %239 = vector.broadcast %cst_99 : f32 to vector<10x32xf32>
    %240 = arith.mulf %238, %239 : vector<10x32xf32>
    %241 = vector.extract_strided_slice %237 {offsets = [0, 32], sizes = [10, 32], strides = [1, 1]} : vector<10x96xf32> to vector<10x32xf32>
    %242 = vector.extract_strided_slice %237 {offsets = [0, 64], sizes = [10, 32], strides = [1, 1]} : vector<10x96xf32> to vector<10x32xf32>
    %243 = vector.extract_strided_slice %240 {offsets = [0, 0], sizes = [10, 8], strides = [1, 1]} : vector<10x32xf32> to vector<10x8xf32>
    %244 = arith.truncf %243 : vector<10x8xf32> to vector<10x8xbf16>
    %245 = vector.extract_strided_slice %241 {offsets = [0, 0], sizes = [10, 8], strides = [1, 1]} : vector<10x32xf32> to vector<10x8xf32>
    %246 = arith.truncf %245 : vector<10x8xf32> to vector<10x8xbf16>
    %cst_100 = arith.constant dense<0.000000e+00> : vector<10x10xf32>
    %247 = tpu.matmul %244, %246, %cst_100 {dimension_numbers = #tpu.dot_dimension_numbers<[1], [1], [0], [0], [0, 0, 1, 0], [], []>} : vector<10x8xbf16>, vector<10x8xbf16>, vector<10x10xf32> -> vector<10x10xf32>
    %248 = arith.addf %247, %18 : vector<10x10xf32>
    %cst_101 = arith.constant dense<0xFF800000> : vector<10xf32>
    %249 = vector.multi_reduction <maximumf>, %248, %cst_101 [1] : vector<10x10xf32> to vector<10xf32>
    %250 = vector.shape_cast %249 : vector<10xf32> to vector<10x1xf32>
    %251 = vector.broadcast %250 : vector<10x1xf32> to vector<10x10xf32>
    %252 = arith.subf %248, %251 : vector<10x10xf32>
    %253 = math.exp %252 : vector<10x10xf32>
    %cst_102 = arith.constant dense<0.000000e+00> : vector<10xf32>
    %254 = vector.multi_reduction <add>, %253, %cst_102 [1] : vector<10x10xf32> to vector<10xf32>
    %255 = vector.shape_cast %254 : vector<10xf32> to vector<10x1xf32>
    %256 = tpu.reciprocal %255 {approx = true} : vector<10x1xf32> -> vector<10x1xf32>
    %257 = vector.broadcast %256 : vector<10x1xf32> to vector<10x10xf32>
    %258 = arith.mulf %253, %257 : vector<10x10xf32>
    %259 = arith.truncf %258 : vector<10x10xf32> to vector<10x10xbf16>
    %260 = vector.extract_strided_slice %242 {offsets = [0, 0], sizes = [10, 8], strides = [1, 1]} : vector<10x32xf32> to vector<10x8xf32>
    %261 = arith.truncf %260 : vector<10x8xf32> to vector<10x8xbf16>
    %cst_103 = arith.constant dense<0.000000e+00> : vector<10x8xf32>
    %262 = tpu.matmul %259, %261, %cst_103 {dimension_numbers = #tpu.dot_dimension_numbers<[1], [0], [0], [1], [0, 0, 1, 1], [], []>} : vector<10x10xbf16>, vector<10x8xbf16>, vector<10x8xf32> -> vector<10x8xf32>
    %263 = vector.extract_strided_slice %240 {offsets = [0, 8], sizes = [10, 8], strides = [1, 1]} : vector<10x32xf32> to vector<10x8xf32>
    %264 = arith.truncf %263 : vector<10x8xf32> to vector<10x8xbf16>
    %265 = vector.extract_strided_slice %241 {offsets = [0, 8], sizes = [10, 8], strides = [1, 1]} : vector<10x32xf32> to vector<10x8xf32>
    %266 = arith.truncf %265 : vector<10x8xf32> to vector<10x8xbf16>
    %cst_104 = arith.constant dense<0.000000e+00> : vector<10x10xf32>
    %267 = tpu.matmul %264, %266, %cst_104 {dimension_numbers = #tpu.dot_dimension_numbers<[1], [1], [0], [0], [0, 0, 1, 0], [], []>} : vector<10x8xbf16>, vector<10x8xbf16>, vector<10x10xf32> -> vector<10x10xf32>
    %268 = arith.addf %267, %18 : vector<10x10xf32>
    %cst_105 = arith.constant dense<0xFF800000> : vector<10xf32>
    %269 = vector.multi_reduction <maximumf>, %268, %cst_105 [1] : vector<10x10xf32> to vector<10xf32>
    %270 = vector.shape_cast %269 : vector<10xf32> to vector<10x1xf32>
    %271 = vector.broadcast %270 : vector<10x1xf32> to vector<10x10xf32>
    %272 = arith.subf %268, %271 : vector<10x10xf32>
    %273 = math.exp %272 : vector<10x10xf32>
    %cst_106 = arith.constant dense<0.000000e+00> : vector<10xf32>
    %274 = vector.multi_reduction <add>, %273, %cst_106 [1] : vector<10x10xf32> to vector<10xf32>
    %275 = vector.shape_cast %274 : vector<10xf32> to vector<10x1xf32>
    %276 = tpu.reciprocal %275 {approx = true} : vector<10x1xf32> -> vector<10x1xf32>
    %277 = vector.broadcast %276 : vector<10x1xf32> to vector<10x10xf32>
    %278 = arith.mulf %273, %277 : vector<10x10xf32>
    %279 = arith.truncf %278 : vector<10x10xf32> to vector<10x10xbf16>
    %280 = vector.extract_strided_slice %242 {offsets = [0, 8], sizes = [10, 8], strides = [1, 1]} : vector<10x32xf32> to vector<10x8xf32>
    %281 = arith.truncf %280 : vector<10x8xf32> to vector<10x8xbf16>
    %cst_107 = arith.constant dense<0.000000e+00> : vector<10x8xf32>
    %282 = tpu.matmul %279, %281, %cst_107 {dimension_numbers = #tpu.dot_dimension_numbers<[1], [0], [0], [1], [0, 0, 1, 1], [], []>} : vector<10x10xbf16>, vector<10x8xbf16>, vector<10x8xf32> -> vector<10x8xf32>
    %283 = vector.extract_strided_slice %240 {offsets = [0, 16], sizes = [10, 8], strides = [1, 1]} : vector<10x32xf32> to vector<10x8xf32>
    %284 = arith.truncf %283 : vector<10x8xf32> to vector<10x8xbf16>
    %285 = vector.extract_strided_slice %241 {offsets = [0, 16], sizes = [10, 8], strides = [1, 1]} : vector<10x32xf32> to vector<10x8xf32>
    %286 = arith.truncf %285 : vector<10x8xf32> to vector<10x8xbf16>
    %cst_108 = arith.constant dense<0.000000e+00> : vector<10x10xf32>
    %287 = tpu.matmul %284, %286, %cst_108 {dimension_numbers = #tpu.dot_dimension_numbers<[1], [1], [0], [0], [0, 0, 1, 0], [], []>} : vector<10x8xbf16>, vector<10x8xbf16>, vector<10x10xf32> -> vector<10x10xf32>
    %288 = arith.addf %287, %18 : vector<10x10xf32>
    %cst_109 = arith.constant dense<0xFF800000> : vector<10xf32>
    %289 = vector.multi_reduction <maximumf>, %288, %cst_109 [1] : vector<10x10xf32> to vector<10xf32>
    %290 = vector.shape_cast %289 : vector<10xf32> to vector<10x1xf32>
    %291 = vector.broadcast %290 : vector<10x1xf32> to vector<10x10xf32>
    %292 = arith.subf %288, %291 : vector<10x10xf32>
    %293 = math.exp %292 : vector<10x10xf32>
    %cst_110 = arith.constant dense<0.000000e+00> : vector<10xf32>
    %294 = vector.multi_reduction <add>, %293, %cst_110 [1] : vector<10x10xf32> to vector<10xf32>
    %295 = vector.shape_cast %294 : vector<10xf32> to vector<10x1xf32>
    %296 = tpu.reciprocal %295 {approx = true} : vector<10x1xf32> -> vector<10x1xf32>
    %297 = vector.broadcast %296 : vector<10x1xf32> to vector<10x10xf32>
    %298 = arith.mulf %293, %297 : vector<10x10xf32>
    %299 = arith.truncf %298 : vector<10x10xf32> to vector<10x10xbf16>
    %300 = vector.extract_strided_slice %242 {offsets = [0, 16], sizes = [10, 8], strides = [1, 1]} : vector<10x32xf32> to vector<10x8xf32>
    %301 = arith.truncf %300 : vector<10x8xf32> to vector<10x8xbf16>
    %cst_111 = arith.constant dense<0.000000e+00> : vector<10x8xf32>
    %302 = tpu.matmul %299, %301, %cst_111 {dimension_numbers = #tpu.dot_dimension_numbers<[1], [0], [0], [1], [0, 0, 1, 1], [], []>} : vector<10x10xbf16>, vector<10x8xbf16>, vector<10x8xf32> -> vector<10x8xf32>
    %303 = vector.extract_strided_slice %240 {offsets = [0, 24], sizes = [10, 8], strides = [1, 1]} : vector<10x32xf32> to vector<10x8xf32>
    %304 = arith.truncf %303 : vector<10x8xf32> to vector<10x8xbf16>
    %305 = vector.extract_strided_slice %241 {offsets = [0, 24], sizes = [10, 8], strides = [1, 1]} : vector<10x32xf32> to vector<10x8xf32>
    %306 = arith.truncf %305 : vector<10x8xf32> to vector<10x8xbf16>
    %cst_112 = arith.constant dense<0.000000e+00> : vector<10x10xf32>
    %307 = tpu.matmul %304, %306, %cst_112 {dimension_numbers = #tpu.dot_dimension_numbers<[1], [1], [0], [0], [0, 0, 1, 0], [], []>} : vector<10x8xbf16>, vector<10x8xbf16>, vector<10x10xf32> -> vector<10x10xf32>
    %308 = arith.addf %307, %18 : vector<10x10xf32>
    %cst_113 = arith.constant dense<0xFF800000> : vector<10xf32>
    %309 = vector.multi_reduction <maximumf>, %308, %cst_113 [1] : vector<10x10xf32> to vector<10xf32>
    %310 = vector.shape_cast %309 : vector<10xf32> to vector<10x1xf32>
    %311 = vector.broadcast %310 : vector<10x1xf32> to vector<10x10xf32>
    %312 = arith.subf %308, %311 : vector<10x10xf32>
    %313 = math.exp %312 : vector<10x10xf32>
    %cst_114 = arith.constant dense<0.000000e+00> : vector<10xf32>
    %314 = vector.multi_reduction <add>, %313, %cst_114 [1] : vector<10x10xf32> to vector<10xf32>
    %315 = vector.shape_cast %314 : vector<10xf32> to vector<10x1xf32>
    %316 = tpu.reciprocal %315 {approx = true} : vector<10x1xf32> -> vector<10x1xf32>
    %317 = vector.broadcast %316 : vector<10x1xf32> to vector<10x10xf32>
    %318 = arith.mulf %313, %317 : vector<10x10xf32>
    %319 = arith.truncf %318 : vector<10x10xf32> to vector<10x10xbf16>
    %320 = vector.extract_strided_slice %242 {offsets = [0, 24], sizes = [10, 8], strides = [1, 1]} : vector<10x32xf32> to vector<10x8xf32>
    %321 = arith.truncf %320 : vector<10x8xf32> to vector<10x8xbf16>
    %cst_115 = arith.constant dense<0.000000e+00> : vector<10x8xf32>
    %322 = tpu.matmul %319, %321, %cst_115 {dimension_numbers = #tpu.dot_dimension_numbers<[1], [0], [0], [1], [0, 0, 1, 1], [], []>} : vector<10x10xbf16>, vector<10x8xbf16>, vector<10x8xf32> -> vector<10x8xf32>
    %323 = tpu.concatenate %262, %282, %302, %322 in 1 : vector<10x8xf32>, vector<10x8xf32>, vector<10x8xf32>, vector<10x8xf32> -> vector<10x32xf32>
    %324 = arith.truncf %323 : vector<10x32xf32> to vector<10x32xbf16>
    %c1_116 = arith.constant 1 : index
    %c0_117 = arith.constant 0 : index
    %c0_118 = arith.constant 0 : index
    %325 = vector.load %arg10[%c1_116, %c0_117, %c0_118] : memref<2x32x32xbf16, #tpu.memory_space<vmem>>, vector<1x32x32xbf16>
    %326 = vector.shape_cast %325 : vector<1x32x32xbf16> to vector<32x32xbf16>
    %cst_119 = arith.constant dense<0.000000e+00> : vector<10x32xf32>
    %327 = tpu.matmul %324, %326, %cst_119 {dimension_numbers = #tpu.dot_dimension_numbers<[1], [0], [0], [1], [0, 0, 1, 1], [], []>} : vector<10x32xbf16>, vector<32x32xbf16>, vector<10x32xf32> -> vector<10x32xf32>
    %c1_120 = arith.constant 1 : index
    %c0_121 = arith.constant 0 : index
    %c0_122 = arith.constant 0 : index
    %328 = vector.load %arg11[%c1_120, %c0_121, %c0_122] : memref<2x1x32xf32, #tpu.memory_space<vmem>>, vector<1x1x32xf32>
    %329 = vector.shape_cast %328 : vector<1x1x32xf32> to vector<1x32xf32>
    %330 = vector.broadcast %329 : vector<1x32xf32> to vector<10x32xf32>
    %331 = arith.addf %327, %330 : vector<10x32xf32>
    %332 = arith.addf %203, %331 : vector<10x32xf32>
    %c1_123 = arith.constant 1 : index
    %c0_124 = arith.constant 0 : index
    %c0_125 = arith.constant 0 : index
    %333 = vector.load %arg12[%c1_123, %c0_124, %c0_125] : memref<2x1x32xf32, #tpu.memory_space<vmem>>, vector<1x1x32xf32>
    %334 = vector.shape_cast %333 : vector<1x1x32xf32> to vector<1x32xf32>
    %c1_126 = arith.constant 1 : index
    %c0_127 = arith.constant 0 : index
    %c0_128 = arith.constant 0 : index
    %335 = vector.load %arg13[%c1_126, %c0_127, %c0_128] : memref<2x1x32xf32, #tpu.memory_space<vmem>>, vector<1x1x32xf32>
    %336 = vector.shape_cast %335 : vector<1x1x32xf32> to vector<1x32xf32>
    %cst_129 = arith.constant dense<0.000000e+00> : vector<10xf32>
    %337 = vector.multi_reduction <add>, %332, %cst_129 [1] : vector<10x32xf32> to vector<10xf32>
    %338 = vector.shape_cast %337 : vector<10xf32> to vector<10x1xf32>
    %cst_130 = arith.constant 3.200000e+01 : f32
    %339 = vector.broadcast %cst_130 : f32 to vector<10x1xf32>
    %340 = arith.divf %338, %339 : vector<10x1xf32>
    %341 = vector.broadcast %340 : vector<10x1xf32> to vector<10x32xf32>
    %342 = arith.subf %332, %341 : vector<10x32xf32>
    %343 = arith.mulf %342, %342 : vector<10x32xf32>
    %cst_131 = arith.constant dense<0.000000e+00> : vector<10xf32>
    %344 = vector.multi_reduction <add>, %343, %cst_131 [1] : vector<10x32xf32> to vector<10xf32>
    %345 = vector.shape_cast %344 : vector<10xf32> to vector<10x1xf32>
    %cst_132 = arith.constant 3.200000e+01 : f32
    %346 = vector.broadcast %cst_132 : f32 to vector<10x1xf32>
    %347 = arith.divf %345, %346 : vector<10x1xf32>
    %348 = vector.broadcast %340 : vector<10x1xf32> to vector<10x32xf32>
    %349 = arith.subf %332, %348 : vector<10x32xf32>
    %cst_133 = arith.constant 9.99999996E-13 : f32
    %350 = vector.broadcast %cst_133 : f32 to vector<10x1xf32>
    %351 = arith.addf %347, %350 : vector<10x1xf32>
    %352 = math.rsqrt %351 : vector<10x1xf32>
    %353 = vector.broadcast %352 : vector<10x1xf32> to vector<10x32xf32>
    %354 = arith.mulf %349, %353 : vector<10x32xf32>
    %355 = vector.broadcast %334 : vector<1x32xf32> to vector<10x32xf32>
    %356 = arith.mulf %354, %355 : vector<10x32xf32>
    %357 = vector.broadcast %336 : vector<1x32xf32> to vector<10x32xf32>
    %358 = arith.addf %356, %357 : vector<10x32xf32>
    %359 = arith.truncf %358 : vector<10x32xf32> to vector<10x32xbf16>
    %c1_134 = arith.constant 1 : index
    %c0_135 = arith.constant 0 : index
    %c0_136 = arith.constant 0 : index
    %360 = vector.load %arg14[%c1_134, %c0_135, %c0_136] : memref<2x32x128xbf16, #tpu.memory_space<vmem>>, vector<1x32x128xbf16>
    %361 = vector.shape_cast %360 : vector<1x32x128xbf16> to vector<32x128xbf16>
    %cst_137 = arith.constant dense<0.000000e+00> : vector<10x128xf32>
    %362 = tpu.matmul %359, %361, %cst_137 {dimension_numbers = #tpu.dot_dimension_numbers<[1], [0], [0], [1], [0, 0, 1, 1], [], []>} : vector<10x32xbf16>, vector<32x128xbf16>, vector<10x128xf32> -> vector<10x128xf32>
    %c1_138 = arith.constant 1 : index
    %c0_139 = arith.constant 0 : index
    %c0_140 = arith.constant 0 : index
    %363 = vector.load %arg15[%c1_138, %c0_139, %c0_140] : memref<2x1x128xf32, #tpu.memory_space<vmem>>, vector<1x1x128xf32>
    %364 = vector.shape_cast %363 : vector<1x1x128xf32> to vector<1x128xf32>
    %365 = vector.broadcast %364 : vector<1x128xf32> to vector<10x128xf32>
    %366 = arith.addf %362, %365 : vector<10x128xf32>
    %367 = arith.mulf %366, %366 : vector<10x128xf32>
    %368 = arith.mulf %366, %367 : vector<10x128xf32>
    %cst_141 = arith.constant 4.471500e-02 : f32
    %369 = vector.broadcast %cst_141 : f32 to vector<10x128xf32>
    %370 = arith.mulf %369, %368 : vector<10x128xf32>
    %371 = arith.addf %366, %370 : vector<10x128xf32>
    %cst_142 = arith.constant 0.797884583 : f32
    %372 = vector.broadcast %cst_142 : f32 to vector<10x128xf32>
    %373 = arith.mulf %372, %371 : vector<10x128xf32>
    %374 = math.tanh %373 : vector<10x128xf32>
    %cst_143 = arith.constant 1.000000e+00 : f32
    %375 = vector.broadcast %cst_143 : f32 to vector<10x128xf32>
    %376 = arith.addf %375, %374 : vector<10x128xf32>
    %cst_144 = arith.constant 5.000000e-01 : f32
    %377 = vector.broadcast %cst_144 : f32 to vector<10x128xf32>
    %378 = arith.mulf %377, %376 : vector<10x128xf32>
    %379 = arith.mulf %366, %378 : vector<10x128xf32>
    %380 = arith.truncf %379 : vector<10x128xf32> to vector<10x128xbf16>
    %c1_145 = arith.constant 1 : index
    %c0_146 = arith.constant 0 : index
    %c0_147 = arith.constant 0 : index
    %381 = vector.load %arg16[%c1_145, %c0_146, %c0_147] : memref<2x128x32xbf16, #tpu.memory_space<vmem>>, vector<1x128x32xbf16>
    %382 = vector.shape_cast %381 : vector<1x128x32xbf16> to vector<128x32xbf16>
    %cst_148 = arith.constant dense<0.000000e+00> : vector<10x32xf32>
    %383 = tpu.matmul %380, %382, %cst_148 {dimension_numbers = #tpu.dot_dimension_numbers<[1], [0], [0], [1], [0, 0, 1, 1], [], []>} : vector<10x128xbf16>, vector<128x32xbf16>, vector<10x32xf32> -> vector<10x32xf32>
    %c1_149 = arith.constant 1 : index
    %c0_150 = arith.constant 0 : index
    %c0_151 = arith.constant 0 : index
    %384 = vector.load %arg17[%c1_149, %c0_150, %c0_151] : memref<2x1x32xf32, #tpu.memory_space<vmem>>, vector<1x1x32xf32>
    %385 = vector.shape_cast %384 : vector<1x1x32xf32> to vector<1x32xf32>
    %386 = vector.broadcast %385 : vector<1x32xf32> to vector<10x32xf32>
    %387 = arith.addf %383, %386 : vector<10x32xf32>
    %388 = arith.addf %332, %387 : vector<10x32xf32>
    %389 = vector.extract_strided_slice %388 {offsets = [0, 0], sizes = [1, 32], strides = [1, 1]} : vector<10x32xf32> to vector<1x32xf32>
    %390 = vector.extract_strided_slice %388 {offsets = [5, 0], sizes = [1, 32], strides = [1, 1]} : vector<10x32xf32> to vector<1x32xf32>
    %391 = tpu.concatenate %389, %390 in 0 : vector<1x32xf32>, vector<1x32xf32> -> vector<2x32xf32>
    %c0_152 = arith.constant 0 : index
    %c0_153 = arith.constant 0 : index
    %392 = vector.load %arg18[%c0_152, %c0_153] : memref<1x32xf32, #tpu.memory_space<vmem>>, vector<1x32xf32>
    %c0_154 = arith.constant 0 : index
    %c0_155 = arith.constant 0 : index
    %393 = vector.load %arg19[%c0_154, %c0_155] : memref<1x32xf32, #tpu.memory_space<vmem>>, vector<1x32xf32>
    %cst_156 = arith.constant dense<0.000000e+00> : vector<2xf32>
    %394 = vector.multi_reduction <add>, %391, %cst_156 [1] : vector<2x32xf32> to vector<2xf32>
    %395 = vector.shape_cast %394 : vector<2xf32> to vector<2x1xf32>
    %cst_157 = arith.constant 3.200000e+01 : f32
    %396 = vector.broadcast %cst_157 : f32 to vector<2x1xf32>
    %397 = arith.divf %395, %396 : vector<2x1xf32>
    %398 = vector.broadcast %397 : vector<2x1xf32> to vector<2x32xf32>
    %399 = arith.subf %391, %398 : vector<2x32xf32>
    %400 = arith.mulf %399, %399 : vector<2x32xf32>
    %cst_158 = arith.constant dense<0.000000e+00> : vector<2xf32>
    %401 = vector.multi_reduction <add>, %400, %cst_158 [1] : vector<2x32xf32> to vector<2xf32>
    %402 = vector.shape_cast %401 : vector<2xf32> to vector<2x1xf32>
    %cst_159 = arith.constant 3.200000e+01 : f32
    %403 = vector.broadcast %cst_159 : f32 to vector<2x1xf32>
    %404 = arith.divf %402, %403 : vector<2x1xf32>
    %405 = vector.broadcast %397 : vector<2x1xf32> to vector<2x32xf32>
    %406 = arith.subf %391, %405 : vector<2x32xf32>
    %cst_160 = arith.constant 9.99999996E-13 : f32
    %407 = vector.broadcast %cst_160 : f32 to vector<2x1xf32>
    %408 = arith.addf %404, %407 : vector<2x1xf32>
    %409 = math.rsqrt %408 : vector<2x1xf32>
    %410 = vector.broadcast %409 : vector<2x1xf32> to vector<2x32xf32>
    %411 = arith.mulf %406, %410 : vector<2x32xf32>
    %412 = vector.broadcast %392 : vector<1x32xf32> to vector<2x32xf32>
    %413 = arith.mulf %411, %412 : vector<2x32xf32>
    %414 = vector.broadcast %393 : vector<1x32xf32> to vector<2x32xf32>
    %415 = arith.addf %413, %414 : vector<2x32xf32>
    %416 = arith.truncf %415 : vector<2x32xf32> to vector<2x32xbf16>
    %c0_161 = arith.constant 0 : index
    %c0_162 = arith.constant 0 : index
    %417 = vector.load %arg20[%c0_161, %c0_162] : memref<32x256xbf16, #tpu.memory_space<vmem>>, vector<32x256xbf16>
    %cst_163 = arith.constant dense<0.000000e+00> : vector<2x256xf32>
    %418 = tpu.matmul %416, %417, %cst_163 {dimension_numbers = #tpu.dot_dimension_numbers<[1], [0], [0], [1], [0, 0, 1, 1], [], []>} : vector<2x32xbf16>, vector<32x256xbf16>, vector<2x256xf32> -> vector<2x256xf32>
    %c0_164 = arith.constant 0 : index
    %c0_165 = arith.constant 0 : index
    %419 = vector.load %arg21[%c0_164, %c0_165] : memref<1x256xf32, #tpu.memory_space<vmem>>, vector<1x256xf32>
    %420 = vector.broadcast %419 : vector<1x256xf32> to vector<2x256xf32>
    %421 = arith.addf %418, %420 : vector<2x256xf32>
    %cst_166 = arith.constant 0.000000e+00 : f32
    %422 = vector.broadcast %cst_166 : f32 to vector<2x256xf32>
    %423 = arith.maximumf %421, %422 : vector<2x256xf32>
    %424 = arith.truncf %423 : vector<2x256xf32> to vector<2x256xbf16>
    %c0_167 = arith.constant 0 : index
    %c0_168 = arith.constant 0 : index
    %425 = vector.load %arg22[%c0_167, %c0_168] : memref<256x128xbf16, #tpu.memory_space<vmem>>, vector<256x128xbf16>
    %cst_169 = arith.constant dense<0.000000e+00> : vector<2x128xf32>
    %426 = tpu.matmul %424, %425, %cst_169 {dimension_numbers = #tpu.dot_dimension_numbers<[1], [0], [0], [1], [0, 0, 1, 1], [], []>} : vector<2x256xbf16>, vector<256x128xbf16>, vector<2x128xf32> -> vector<2x128xf32>
    %c0_170 = arith.constant 0 : index
    %c0_171 = arith.constant 0 : index
    %427 = vector.load %arg23[%c0_170, %c0_171] : memref<1x128xf32, #tpu.memory_space<vmem>>, vector<1x128xf32>
    %428 = vector.broadcast %427 : vector<1x128xf32> to vector<2x128xf32>
    %429 = arith.addf %426, %428 : vector<2x128xf32>
    %cst_172 = arith.constant 0.000000e+00 : f32
    %430 = vector.broadcast %cst_172 : f32 to vector<2x128xf32>
    %431 = arith.maximumf %429, %430 : vector<2x128xf32>
    %432 = arith.truncf %431 : vector<2x128xf32> to vector<2x128xbf16>
    %c0_173 = arith.constant 0 : index
    %c0_174 = arith.constant 0 : index
    %433 = vector.load %arg24[%c0_173, %c0_174] : memref<128x3xbf16, #tpu.memory_space<vmem>>, vector<128x3xbf16>
    %cst_175 = arith.constant dense<0.000000e+00> : vector<2x3xf32>
    %434 = tpu.matmul %432, %433, %cst_175 {dimension_numbers = #tpu.dot_dimension_numbers<[1], [0], [0], [1], [0, 0, 1, 1], [], []>} : vector<2x128xbf16>, vector<128x3xbf16>, vector<2x3xf32> -> vector<2x3xf32>
    %c0_176 = arith.constant 0 : index
    %c0_177 = arith.constant 0 : index
    %435 = vector.load %arg25[%c0_176, %c0_177] : memref<1x3xf32, #tpu.memory_space<vmem>>, vector<1x3xf32>
    %436 = vector.broadcast %435 : vector<1x3xf32> to vector<2x3xf32>
    %437 = arith.addf %434, %436 : vector<2x3xf32>
    %c0_178 = arith.constant 0 : index
    %c0_179 = arith.constant 0 : index
    %438 = vector.load %arg26[%c0_178, %c0_179] : memref<2x3xf32, #tpu.memory_space<vmem>>, vector<2x3xf32>
    tpu.vector_store %arg26[%c0_178, %c0_179], %437 {strides = array<i32>} : memref<2x3xf32, #tpu.memory_space<vmem>>, vector<2x3xf32>,
    return
  }
}

</mosaic_0001>

<bundles_post_ra>
// kernel: _lambda_.1
= control target key start
LH: loop header
LB: loop body
LE: loop exit
PB: predicated region body
PF: predicated region fallthrough
CT: control target
= control target key end

     0   :  { %s4113_s0 = inlined_call_operand.vmem [shape: f32[8,192], index: 0, kind: input, shape index: {}]   ;;  %s4114_s1 = inlined_call_operand.vmem [shape: f32[10,10], index: 1, kind: input, shape index: {}]   ;;  %s4115_s2 = inlined_call_operand.vmem [shape: bf16[192,32], index: 2, kind: input, shape index: {}]   ;;  %s4116_s3 = inlined_call_operand.vmem [shape: f32[1,32], index: 3, kind: input, shape index: {}, may-alias: {3,19}]   ;;  %s4117_s4 = inlined_call_operand.vmem [shape: f32[1,32], index: 4, kind: input, shape index: {}]   ;;  %s4118_s5 = inlined_call_operand.vmem [shape: f32[5,32], index: 5, kind: input, shape index: {}]   ;;  %s4119_s6 = inlined_call_operand.vmem [shape: f32[2,1,32], index: 6, kind: input, shape index: {}, may-alias: {6,12}]   ;;  %s4120_s7 = inlined_call_operand.vmem [shape: f32[2,1,32], index: 7, kind: input, shape index: {}, may-alias: {7,11,13,17}]   ;;  %s4121_s8 = inlined_call_operand.vmem [shape: bf16[2,32,96], index: 8, kind: input, shape index: {}]   ;;  %s4122_s9 = inlined_call_operand.vmem [shape: f32[2,1,96], index: 9, kind: input, shape index: {}]   ;;  %s4123_s10 = inlined_call_operand.vmem [shape: bf16[2,32,32], index: 10, kind: input, shape index: {}]   ;;  %s4124_s11 = inlined_call_operand.vmem [shape: f32[2,1,32], index: 11, kind: input, shape index: {}, may-alias: {7,11,13,17}]   ;;  %s4125_s12 = inlined_call_operand.vmem [shape: f32[2,1,32], index: 12, kind: input, shape index: {}, may-alias: {6,12}]   ;;  %s4126_s13 = inlined_call_operand.vmem [shape: f32[2,1,32], index: 13, kind: input, shape index: {}, may-alias: {7,11,13,17}]   ;;  %s4127_s14 = inlined_call_operand.vmem [shape: bf16[2,32,128], index: 14, kind: input, shape index: {}]   ;;  %s4128_s15 = inlined_call_operand.vmem [shape: f32[2,1,128], index: 15, kind: input, shape index: {}]   ;;  %s4129_s16 = inlined_call_operand.vmem [shape: bf16[2,128,32], index: 16, kind: input, shape index: {}]   ;;  %s4130_s17 = inlined_call_operand.vmem [shape: f32[2,1,32], index: 17, kind: input, shape index: {}, may-alias: {7,11,13,17}]   ;;  %s4131_s18 = inlined_call_operand.vmem [shape: f32[1,32], index: 18, kind: input, shape index: {}]   ;;  %s4132_s19 = inlined_call_operand.vmem [shape: f32[1,32], index: 19, kind: input, shape index: {}, may-alias: {3,19}]   ;;  %s4133_s20 = inlined_call_operand.vmem [shape: bf16[32,256], index: 20, kind: input, shape index: {}]   ;;  %s4134_s21 = inlined_call_operand.vmem [shape: f32[1,256], index: 21, kind: input, shape index: {}]   ;;  %s4135_s22 = inlined_call_operand.vmem [shape: bf16[256,128], index: 22, kind: input, shape index: {}]   ;;  %s4136_s23 = inlined_call_operand.vmem [shape: f32[1,128], index: 23, kind: input, shape index: {}]   ;;  %s4137_s24 = inlined_call_operand.vmem [shape: bf16[128,3], index: 24, kind: input, shape index: {}]   ;;  %s4138_s25 = inlined_call_operand.vmem [shape: f32[1,3], index: 25, kind: input, shape index: {}]   ;;  %s4139_s26 = inlined_call_operand.hbm [shape: f32[2,3], index: 26, kind: output, shape index: {}]  }
   0x1   :  { %4160 = sst [smem:[#allocation5_spill]] %s4113_s0 }
   0x2   :  { %4161 = sst [smem:[#allocation6_spill]] %s4114_s1 }
   0x3   :  { %4162 = sst [smem:[#allocation7_spill]] %s4115_s2 }
   0x4   :  { %4163 = sst [smem:[#allocation8_spill]] %s4116_s3 }
   0x5   :  { %4164 = sst [smem:[#allocation9_spill]] %s4117_s4 }
   0x6   :  { %4165 = sst [smem:[#allocation10_spill]] %s4118_s5 }
   0x7   :  { %4166 = sst [smem:[#allocation11_spill]] %s4119_s6 }
   0x8   :  { %4167 = sst [smem:[#allocation12_spill]] %s4120_s7 }
   0x9   :  { %4168 = sst [smem:[#allocation13_spill]] %s4121_s8 }
   0xa   :  { %4169 = sst [smem:[#allocation14_spill]] %s4122_s9 }
   0xb   :  { %4170 = sst [smem:[#allocation15_spill]] %s4123_s10 }
   0xc   :  { %s4171_s7 = sld [smem:[#allocation7_spill]]  ;;  %v3298_v1 = vmov 0   ;;  %s4172_s6 = sld [smem:[#allocation5_spill]]  ;;  %vm192_vm0 = vcmask 523264  }
   0xd   :  { %196 = vmatprep.subr.bf16.mxu0 %v3298_v1 }
  0x12   :  { %v3112_v0 = vld [vmem:[%s4171_s7] sm:$0xff]   ;;  %v3113_v2 = vld [vmem:[%s4171_s7 + $0x8] sm:$0xff]   ;;  %v3114_v3 = vld [vmem:[%s4171_s7 + $0x10] sm:$0xff]  }
  0x13   :  { %197 = vmatpush1.bf16.msra.mxu0 %v3112_v0  ;;  %v3115_v4 = vld [vmem:[%s4171_s7 + $0x18] sm:$0xff]   ;;  %v3116_v5 = vld [vmem:[%s4171_s7 + $0x20] sm:$0xff]   ;;  %v86_v6 = vld [vmem:[%s4172_s6 + $0x8] sm:$0xff] }
  0x14   :  { %198 = vmatprep.subr.bf16.mxu0 %v3298_v1  ;;  %v88_v7 = vpack.c.bf16 %v86_v6, %v86_v6  ;;  %v3117_v8 = vld [vmem:[%s4171_s7 + $0x28] sm:$0xff]   ;;  %v3118_v9 = vld [vmem:[%s4171_s7 + $0x30] sm:$0xff]   ;;  %v3119_v10 = vld [vmem:[%s4171_s7 + $0x38] sm:$0xff]  }
  0x15   :  { %v3120_v11 = vld [vmem:[%s4171_s7 + $0x40] sm:$0xff]   ;;  %v3121_v12 = vld [vmem:[%s4171_s7 + $0x48] sm:$0xff]   ;;  %v3122_v13 = vld [vmem:[%s4171_s7 + $0x50] sm:$0xff]  }
  0x16   :  { %2625 = vmatprep.mubr.msk.bf16.mxu0 %vm192_vm0, %v88_v7  ;;  %v3123_v14 = vld [vmem:[%s4171_s7 + $0x58] sm:$0xff]   ;;  %v85_v15 = vld [vmem:[%s4172_s6] sm:$0xff] }
  0x17   :  { %199 = vmatpush1.bf16.msra.mxu0 %v3113_v2  ;;  %v87_v16 = vpack.c.bf16 %v85_v15, %v85_v15 }
  0x18   :  { %200 = vmatprep.subr.bf16.mxu0 %v3298_v1 }
  0x1b   :  { %201 = vmatpush1.bf16.msra.mxu0 %v3114_v3 }
  0x1c   :  { %202 = vmatprep.subr.bf16.mxu0 %v3298_v1 }
  0x1f   :  { %203 = vmatpush1.bf16.msra.mxu0 %v3115_v4 }
  0x20   :  { %204 = vmatprep.subr.bf16.mxu0 %v3298_v1 }
  0x23   :  { %205 = vmatpush1.bf16.msra.mxu0 %v3116_v5 }
  0x24   :  { %206 = vmatprep.subr.bf16.mxu0 %v3298_v1 }
  0x27   :  { %207 = vmatpush1.bf16.msra.mxu0 %v3117_v8 }
  0x28   :  { %208 = vmatprep.subr.bf16.mxu0 %v3298_v1 }
  0x2b   :  { %209 = vmatpush1.bf16.msra.mxu0 %v3118_v9 }
  0x2c   :  { %210 = vmatprep.subr.bf16.mxu0 %v3298_v1 }
  0x2f   :  { %211 = vmatpush1.bf16.msra.mxu0 %v3119_v10 }
  0x30   :  { %212 = vmatprep.subr.bf16.mxu0 %v3298_v1 }
  0x33   :  { %213 = vmatpush1.bf16.msra.mxu0 %v3120_v11 }
  0x34   :  { %214 = vmatprep.subr.bf16.mxu0 %v3298_v1 }
  0x37   :  { %215 = vmatpush1.bf16.msra.mxu0 %v3121_v12 }
  0x38   :  { %216 = vmatprep.subr.bf16.mxu0 %v3298_v1 }
  0x3b   :  { %217 = vmatpush1.bf16.msra.mxu0 %v3122_v13 }
  0x3c   :  { %218 = vmatprep.subr.bf16.mxu0 %v3298_v1 }
  0x3f   :  { %219 = vmatpush1.bf16.msra.mxu0 %v3123_v14 }
  0x42   :  { %229 = vmatmul.mubr.bf16.vlgmr.msra.gmra.mrb[0].mxu0 %v87_v16 }
  0x43   :  { %31 = vsyncpa [#allocation3], 0  ;;  %v250_v17 = vlaneseq  ;;  %s4173_s4 = sld [smem:[#allocation10_spill]]  ;;  %s4174_s0 = sld [smem:[#allocation9_spill]]  ;;  %vm258_vm1 = vcmask 1040384   ;;  %vm260_vm2 = vcmask 1044480  }
  0x44   :  { %s4175_s30 = sld [smem:[#allocation8_spill]]  ;;  %vm262_vm3 = vcmask 1045504   ;;  %vm268_vm4 = vcmask 261120   ;;  %vm272_vm5 = vcmask 254976   ;;  %s4176_s10 = sld [smem:[#allocation13_spill]]  ;;  %v3299_v52 = vmov 0.0  }
  0x45   :  { %v3508_v19 = vshrl.u32 %v250_v17, 7  ;;  %2860 = vmatprep.subr.bf16.mxu1 %v3299_v52  ;;  %2910 = vmatprep.subr.bf16.mxu0 %v3299_v52  ;;  %vm3300_vm6 = vmmov 0   ;;  %s4177_s8 = sld [smem:[#allocation11_spill]]  ;;  %s4178_s7 = sld [smem:[#allocation12_spill]]  ;;  %vm388_vm7 = vcmask 64512   ;;  %vm436_vm8 = vcmask 80896  }
  0x46   :  { %2864 = vmatprep.mubr.msk.bf16.mxu1 %vm3300_vm6, %v3299_v52  ;;  %2912 = vmatprep.mubr.msk.bf16.mxu0 %vm3300_vm6, %v3299_v52  ;;  %s4179_s6 = sld [smem:[#allocation14_spill]]  ;;  %s3302_s2 = smov 88   ;;  %vm440_vm9 = vcmask 74752   ;;  %vm906_vm10 = vcmask 130048   ;;  %vm909_vm11 = vcmask 195584   ;;  %vm2596_vm12 = vcmask 17408  }
  0x47   :  { %v252_v26 = vsub.s32 0, %v3508_v19  ;;  %s4159_s5 = smov 120   ;;  %s4180_s3 = sld [smem:[#allocation6_spill]] }
  0x48   :  { %s4155_s29 = smov 64   ;;  %s4154_s9 = smov 112  }
  0x49   :  { %v236_v18 = vld [vmem:[%s4173_s4] sm:$0x1f]  ;;  %s4148_s1 = smov 56   ;;  %s4149_s27 = smov 48  }
  0x4a   :  { %v237_v20 = vld [vmem:[%s4174_s0] sm:$0x1]  ;;  %v240_v22 = vrot.slane %v236_v18, 1  ;;  %v243_v23 = vrot.slane %v236_v18, 5  ;;  %v3125_v53 = vld [vmem:[%s4176_s10 + $0x8] sm:$0xff]   ;;  %s4158_s0 = smov 80  }
  0x4b   :  { %v2612_v21 = vld [vmem:[%s4175_s30] ss:$0 sm:$0xff]  ;;  %v238_v25 = vadd.f32 %v237_v20, %v236_v18  ;;  %s3301_s30 = smov 96   ;;  %s4150_s28 = smov 104  }
  0x4c   :  { %v3124_v51 = vld [vmem:[%s4176_s10] sm:$0xff]   ;;  %s4156_s4 = smov 72  }
  0x4d   :  { %v253_v33 = vrot.slane %v238_v25, %v252_v26  ;;  %2861 = vmatpush3.bf16.msra.mxu1 %v3124_v51  ;;  %v2626_v62 = vld [vmem:[%s4177_s8] ss:$0 sm:$0xff] }
  0x4e   :  { %2862 = vmatprep.subr.bf16.mxu1 %v3299_v52  ;;  %v2627_v3 = vld [vmem:[%s4178_s7] ss:$0 sm:$0xff] }
  0x4f   :  { %v2628_v8 = vld [vmem:[%s4179_s6] ss:$0 sm:$0xff] }
  0x51   :  { %2863 = vmatpush3.bf16.msra.mxu1 %v3125_v53 }
  0x52   :  { %2868 = vmatprep.subr.bf16.mxu1 %v3299_v52 }
 0x115   :  { %v230_v24 = vpop.f32.mrb[0].mxu0 }
 0x116   :  { %v231_v27 = vadd.f32 %v2612_v21, %v230_v24  ;;  %v232_v28 = vpop.f32.mrb[1].mxu0  ;;  %v3584_v24 = vld [vmem:[%s4180_s3 + $0x8] sm:$0x3] }
 0x117   :  { %v233_v29 = vpop.f32.mrb[2].mxu0 }
 0x118   :  { %v242_v30 = vadd.f32 %v240_v22, %v231_v27  ;;  %v245_v31 = vadd.f32 %v243_v23, %v231_v27  ;;  %v234_v32 = vpop.f32.mrb[3].mxu0  ;;  %v3579_v22 = vld [vmem:[%s4180_s3] sm:$0xff] }
 0x11a   :  { %v247_v34 = vrot.slane %v242_v30, 7  ;;  %v3519_v35 = vrot.slane %v245_v31, 6 }
 0x11c   :  { %v259_v36 = vsel %vm258_vm1, %v238_v25, %v247_v34  ;;  %v273_v40 = vsel %vm272_vm5, %v3519_v35, 0.0 }
 0x11d   :  { %v261_v37 = vsel %vm260_vm2, %v259_v36, %v253_v33 }
 0x11e   :  { %v3524_v38 = vsel %vm262_vm3, %v261_v37, %v3519_v35 }
 0x11f   :  { %v269_v39 = vsel %vm268_vm4, %v3524_v38, 0.0 }
 0x120   :  { %270 = vadd.xlane.f32.xlu0 %v269_v39 }
 0x124   :  { %274 = vadd.xlane.f32.xlu0 %v273_v40 }
 0x1ad   :  { %v271_v41 = vpop.xlane.xlu0 %270 }
 0x1ae   :  { %v277_v42 = vmul.f32 0.03125, %v271_v41 }
 0x1b0   :  { %v279_v43 = vsub.f32 %v3524_v38, %v277_v42 }
 0x1b1   :  { %v275_v44 = vpop.xlane.xlu0 %274 }
 0x1b2   :  { %v278_v45 = vmul.f32 0.03125, %v275_v44  ;;  %v281_v46 = vmul.f32 %v279_v43, %v279_v43 }
 0x1b4   :  { %v280_v47 = vsub.f32 %v3519_v35, %v278_v45  ;;  %v283_v48 = vsel %vm268_vm4, %v281_v46, 0.0 }
 0x1b5   :  { %284 = vadd.xlane.f32.xlu1 %v283_v48 }
 0x1b6   :  { %v282_v49 = vmul.f32 %v280_v47, %v280_v47 }
 0x1b8   :  { %v286_v50 = vsel %vm272_vm5, %v282_v49, 0.0 }
 0x1b9   :  { %287 = vadd.xlane.f32.xlu1 %v286_v50 }
 0x242   :  { %v285_v54 = vpop.xlane.xlu1 %284 }
 0x243   :  { %v289_v55 = vmul.f32 0.03125, %v285_v54 }
 0x245   :  { %v291_v56 = vadd.f32 1e-12, %v289_v55 }
 0x246   :  { %v288_v57 = vpop.xlane.xlu1 %287 }
 0x247   :  { %3182 = vrsqrt.f32 %v291_v56  ;;  %v290_v58 = vmul.f32 0.03125, %v288_v57 }
 0x249   :  { %v292_v59 = vadd.f32 1e-12, %v290_v58 }
 0x24b   :  { %3184 = vrsqrt.f32 %v292_v59 }
 0x251   :  { %v3183_v60 = vpop.eup %3182 }
 0x252   :  { %v295_v61 = vmul.f32 %v3183_v60, %v279_v43 }
 0x254   :  { %v303_v2 = vmul.f32 %v2626_v62, %v295_v61 }
 0x255   :  { %v3185_v63 = vpop.eup %3184 }
 0x256   :  { %v296_v0 = vmul.f32 %v3185_v63, %v280_v47  ;;  %v311_v5 = vadd.f32 %v2627_v3, %v303_v2 }
 0x258   :  { %v304_v4 = vmul.f32 %v2626_v62, %v296_v0 }
 0x25a   :  { %v312_v6 = vadd.f32 %v2627_v3, %v304_v4 }
 0x25c   :  { %v313_v7 = vpack.c.bf16 %v312_v6, %v311_v5 }
 0x25e   :  { %2865 = vmatmul.mubr.msk.bf16.vlgmr.msra.gmra.mrb[0].mxu1 %vm268_vm4, %v313_v7 }
 0x25f   :  { %2870 = vmatprep.mubr.msk.bf16.mxu1 %vm3300_vm6, %v3299_v52 }
 0x331   :  { %v374_v9 = vpop.f32.mrb[0].mxu1 }
 0x332   :  { %v375_v10 = vadd.f32 %v2628_v8, %v374_v9  ;;  %v2866_v11 = vpop.f32.mrb[1].mxu1 }
 0x333   :  { %v377_v12 = vpop.f32.mrb[2].mxu1 }
 0x334   :  { %v378_v13 = vadd.f32 %v2628_v8, %v377_v12  ;;  %v2867_v14 = vpop.f32.mrb[3].mxu1  ;;  %v381_v15 = vmul.f32 0.35355338, %v375_v10 }
 0x336   :  { %v382_v16 = vmul.f32 0.35355338, %v378_v13  ;;  %v3560_v17 = vpack.c.bf16 %v378_v13, %v375_v10 }
 0x338   :  { %v3562_v18 = vpack.c.bf16 %v382_v16, %v381_v15  ;;  %386 = vrot.lane.b32.xlu0 %v3560_v17, %s3301_s30 }
 0x33c   :  { %513 = vrot.lane.b32.xlu0 %v3560_v17, %s3302_s2 }
 0x340   :  { %511 = vrot.lane.b32.xlu0 %v3562_v18, %s4159_s5  ;;  %s4190_s5 = smov 40  }
 0x3aa   :  { %v387_v20 = vpop.permute.xlu0 %386 }
 0x3ab   :  { %v393_v21 = vsel %vm388_vm7, %v387_v20, 0 }
 0x3ac   :  { %2869 = vmatpush3.bf16.xpose.msra.mxu1 %v393_v21 }
 0x3ad   :  { %2874 = vmatprep.subr.bf16.mxu1 %v3299_v52 }
 0x3ae   :  { %v514_v54 = vpop.permute.xlu0 %513 }
 0x3af   :  { %v519_v56 = vsel %vm388_vm7, %v514_v54, 0 }
 0x3b2   :  { %v512_v57 = vpop.permute.xlu0 %511 }
 0x3b3   :  { %2871 = vmatmul.mubr.msk.bf16.vlgmr.msra.gmra.mrb[4].mxu1 %vm388_vm7, %v3562_v18 }
 0x3b4   :  { %2876 = vmatprep.mubr.msk.bf16.mxu1 %vm3300_vm6, %v3299_v52 }
 0x486   :  { %v429_v23 = vpop.f32.mrb[4].mxu1 }
 0x487   :  { %v430_v25 = vadd.f32 %v429_v23, %v3579_v22  ;;  %v2872_v27 = vpop.f32.mrb[5].mxu1 }
 0x488   :  { %v432_v28 = vpop.f32.mrb[6].mxu1 }
 0x489   :  { %v433_v29 = vadd.f32 %v432_v28, %v3584_v24  ;;  %v2873_v30 = vpop.f32.mrb[7].mxu1  ;;  %v437_v31 = vsel %vm436_vm8, %v430_v25, -inf }
 0x48a   :  { %438 = vmax.xlane.f32.xlu1 %v437_v31 }
 0x48b   :  { %v441_v32 = vsel %vm440_vm9, %v433_v29, -inf }
 0x48e   :  { %442 = vmax.xlane.f32.xlu1 %v441_v32 }
 0x517   :  { %v439_v33 = vpop.xlane.xlu1 %438 }
 0x518   :  { %v444_v34 = vsub.f32 %v430_v25, %v439_v33 }
 0x51a   :  { %v446_v36 = vmul.f32 1.442695, %v444_v34 }
 0x51b   :  { %v443_v37 = vpop.xlane.xlu1 %442 }
 0x51c   :  { %3186 = vpow2.f32 %v446_v36  ;;  %v445_v39 = vsub.f32 %v433_v29, %v443_v37 }
 0x51e   :  { %v448_v40 = vmul.f32 1.442695, %v445_v39 }
 0x520   :  { %3188 = vpow2.f32 %v448_v40 }
 0x526   :  { %v3187_v41 = vpop.eup %3186 }
 0x527   :  { %v450_v42 = vsel %vm436_vm8, %v3187_v41, 0.0 }
 0x528   :  { %451 = vadd.xlane.f32.xlu1 %v450_v42 }
 0x52a   :  { %v3189_v43 = vpop.eup %3188 }
 0x52b   :  { %v453_v44 = vsel %vm440_vm9, %v3189_v43, 0.0 }
 0x52c   :  { %454 = vadd.xlane.f32.xlu1 %v453_v44 }
 0x53d   :  { %461 = vrot.lane.b32.xlu1 %v3560_v17, %s4155_s29 }
 0x5b5   :  { %v452_v45 = vpop.xlane.xlu1 %451 }
 0x5b6   :  { %3190 = vrcp.f32 %v452_v45 }
 0x5b9   :  { %v455_v46 = vpop.xlane.xlu1 %454 }
 0x5ba   :  { %3192 = vrcp.f32 %v455_v46 }
 0x5bd   :  { %v462_v47 = vpop.permute.xlu1 %461 }
 0x5be   :  { %v467_v48 = vsel %vm260_vm2, %v462_v47, 0 }
 0x5bf   :  { %2875 = vmatpush3.bf16.msra.mxu1 %v467_v48 }
 0x5c0   :  { %2880 = vmatprep.subr.bf16.mxu1 %v3299_v52  ;;  %v3191_v49 = vpop.eup %3190 }
 0x5c1   :  { %v458_v51 = vmul.f32 %v3191_v49, %v3187_v41 }
 0x5c4   :  { %v3193_v50 = vpop.eup %3192 }
 0x5c5   :  { %v459_v53 = vmul.f32 %v3193_v50, %v3189_v43 }
 0x5c7   :  { %v460_v55 = vpack.c.bf16 %v459_v53, %v458_v51 }
 0x5c9   :  { %2877 = vmatmul.mubr.msk.bf16.vlgmr.msra.gmra.mrb[8].mxu1 %vm436_vm8, %v460_v55 }
 0x5ca   :  { %2881 = vmatpush3.bf16.xpose.msra.mxu1 %v519_v56  ;;  %2882 = vmatprep.mubr.msk.bf16.mxu1 %vm3300_vm6, %v3299_v52 }
 0x5cb   :  { %2886 = vmatprep.subr.bf16.mxu1 %v3299_v52 }
 0x5d1   :  { %2883 = vmatmul.mubr.msk.bf16.vlgmr.msra.gmra.mrb[12].mxu1 %vm388_vm7, %v512_v57 }
 0x5d2   :  { %2888 = vmatprep.mubr.msk.bf16.mxu1 %vm3300_vm6, %v3299_v52 }
 0x69c   :  { %v3604_v58 = vpop.f32.mrb[8].mxu1 }
 0x69d   :  { %v2878_v59 = vpop.f32.mrb[9].mxu1 }
 0x69e   :  { %v3606_v60 = vpop.f32.mrb[10].mxu1 }
 0x69f   :  { %v2879_v61 = vpop.f32.mrb[11].mxu1 }
 0x6a4   :  { %v555_v62 = vpop.f32.mrb[12].mxu1 }
 0x6a5   :  { %v556_v63 = vadd.f32 %v555_v62, %v3579_v22  ;;  %v2884_v0 = vpop.f32.mrb[13].mxu1 }
 0x6a6   :  { %v558_v2 = vpop.f32.mrb[14].mxu1 }
 0x6a7   :  { %v559_v3 = vadd.f32 %v558_v2, %v3584_v24  ;;  %v2885_v4 = vpop.f32.mrb[15].mxu1  ;;  %v562_v5 = vsel %vm436_vm8, %v556_v63, -inf }
 0x6a8   :  { %563 = vmax.xlane.f32.xlu0 %v562_v5 }
 0x6a9   :  { %v565_v6 = vsel %vm440_vm9, %v559_v3, -inf }
 0x6aa   :  { %566 = vmax.xlane.f32.xlu1 %v565_v6 }
 0x6bb   :  { %636 = vrot.lane.b32.xlu1 %v3560_v17, %s4158_s0 }
 0x6bf   :  { %634 = vrot.lane.b32.xlu1 %v3562_v18, %s4154_s9  ;;  %s4189_s9 = smov 56  }
 0x735   :  { %v564_v7 = vpop.xlane.xlu0 %563 }
 0x736   :  { %v568_v8 = vsub.f32 %v556_v63, %v564_v7 }
 0x737   :  { %v567_v9 = vpop.xlane.xlu1 %566 }
 0x738   :  { %v570_v10 = vmul.f32 1.442695, %v568_v8  ;;  %v569_v11 = vsub.f32 %v559_v3, %v567_v9 }
 0x73a   :  { %3194 = vpow2.f32 %v570_v10  ;;  %v572_v12 = vmul.f32 1.442695, %v569_v11 }
 0x73b   :  { %v637_v31 = vpop.permute.xlu1 %636 }
 0x73c   :  { %3196 = vpow2.f32 %v572_v12  ;;  %v642_v33 = vsel %vm388_vm7, %v637_v31, 0 }
 0x73f   :  { %v635_v34 = vpop.permute.xlu1 %634 }
 0x744   :  { %v3195_v13 = vpop.eup %3194 }
 0x745   :  { %v574_v14 = vsel %vm436_vm8, %v3195_v13, 0.0 }
 0x746   :  { %v3197_v15 = vpop.eup %3196  ;;  %575 = vadd.xlane.f32.xlu0 %v574_v14 }
 0x747   :  { %v577_v16 = vsel %vm440_vm9, %v3197_v15, 0.0 }
 0x74a   :  { %578 = vadd.xlane.f32.xlu0 %v577_v16 }
 0x760   :  { %585 = vrot.lane.b32.xlu0 %v3560_v17, %s4148_s1  ;;  %s4152_s1 = smov 8  }
 0x7d3   :  { %v576_v20 = vpop.xlane.xlu0 %575 }
 0x7d4   :  { %3198 = vrcp.f32 %v576_v20 }
 0x7d7   :  { %v579_v21 = vpop.xlane.xlu0 %578 }
 0x7d8   :  { %3200 = vrcp.f32 %v579_v21 }
 0x7db   :  { %v586_v23 = vpop.permute.xlu0 %585 }
 0x7dc   :  { %v591_v25 = vsel %vm260_vm2, %v586_v23, 0 }
 0x7dd   :  { %2887 = vmatpush3.bf16.msra.mxu1 %v591_v25 }
 0x7de   :  { %2892 = vmatprep.subr.bf16.mxu1 %v3299_v52  ;;  %v3199_v27 = vpop.eup %3198 }
 0x7df   :  { %v582_v29 = vmul.f32 %v3199_v27, %v3195_v13 }
 0x7e2   :  { %v3201_v28 = vpop.eup %3200 }
 0x7e3   :  { %v583_v30 = vmul.f32 %v3201_v28, %v3197_v15 }
 0x7e5   :  { %v584_v32 = vpack.c.bf16 %v583_v30, %v582_v29 }
 0x7e7   :  { %2889 = vmatmul.mubr.msk.bf16.vlgmr.msra.gmra.mrb[16].mxu1 %vm436_vm8, %v584_v32 }
 0x7e8   :  { %2893 = vmatpush3.bf16.xpose.msra.mxu1 %v642_v33  ;;  %2894 = vmatprep.mubr.msk.bf16.mxu1 %vm3300_vm6, %v3299_v52 }
 0x7e9   :  { %2898 = vmatprep.subr.bf16.mxu1 %v3299_v52 }
 0x7ef   :  { %2895 = vmatmul.mubr.msk.bf16.vlgmr.msra.gmra.mrb[20].mxu1 %vm388_vm7, %v635_v34 }
 0x7f0   :  { %2900 = vmatprep.mubr.msk.bf16.mxu1 %vm3300_vm6, %v3299_v52 }
 0x8ba   :  { %v3630_v36 = vpop.f32.mrb[16].mxu1 }
 0x8bb   :  { %v2890_v37 = vpop.f32.mrb[17].mxu1 }
 0x8bc   :  { %v3632_v39 = vpop.f32.mrb[18].mxu1 }
 0x8bd   :  { %v3082_v40 = vpack.i.bf16 %v3632_v39, %v3630_v36  ;;  %v2891_v41 = vpop.f32.mrb[19].mxu1 }
 0x8c2   :  { %v678_v42 = vpop.f32.mrb[20].mxu1 }
 0x8c3   :  { %v679_v43 = vadd.f32 %v678_v42, %v3579_v22  ;;  %v2896_v44 = vpop.f32.mrb[21].mxu1 }
 0x8c4   :  { %v681_v45 = vpop.f32.mrb[22].mxu1 }
 0x8c5   :  { %v682_v46 = vadd.f32 %v681_v45, %v3584_v24  ;;  %v2897_v47 = vpop.f32.mrb[23].mxu1  ;;  %v685_v48 = vsel %vm436_vm8, %v679_v43, -inf }
 0x8c6   :  { %686 = vmax.xlane.f32.xlu1 %v685_v48 }
 0x8c7   :  { %v688_v49 = vsel %vm440_vm9, %v682_v46, -inf }
 0x8c8   :  { %689 = vmax.xlane.f32.xlu0 %v688_v49 }
 0x8d7   :  { %708 = vrot.lane.b32.xlu1 %v3560_v17, %s4149_s27  ;;  %s4153_s27 = smov 40  }
 0x8db   :  { %757 = vrot.lane.b32.xlu1 %v3562_v18, %s4150_s28  ;;  %s4151_s28 = smov 16  }
 0x953   :  { %v687_v50 = vpop.xlane.xlu1 %686 }
 0x954   :  { %v691_v51 = vsub.f32 %v679_v43, %v687_v50 }
 0x955   :  { %v690_v53 = vpop.xlane.xlu0 %689 }
 0x956   :  { %v693_v54 = vmul.f32 1.442695, %v691_v51  ;;  %v692_v55 = vsub.f32 %v682_v46, %v690_v53 }
 0x957   :  { %v709_v56 = vpop.permute.xlu1 %708 }
 0x958   :  { %3202 = vpow2.f32 %v693_v54  ;;  %v695_v57 = vmul.f32 1.442695, %v692_v55  ;;  %v714_v59 = vsel %vm260_vm2, %v709_v56, 0 }
 0x959   :  { %2899 = vmatpush3.bf16.msra.mxu1 %v714_v59 }
 0x95a   :  { %3204 = vpow2.f32 %v695_v57  ;;  %2904 = vmatprep.subr.bf16.mxu1 %v3299_v52 }
 0x95b   :  { %v758_v10 = vpop.permute.xlu1 %757 }
 0x962   :  { %v3203_v61 = vpop.eup %3202 }
 0x963   :  { %v697_v62 = vsel %vm436_vm8, %v3203_v61, 0.0 }
 0x964   :  { %v3205_v63 = vpop.eup %3204  ;;  %698 = vadd.xlane.f32.xlu0 %v697_v62 }
 0x965   :  { %v700_v18 = vsel %vm440_vm9, %v3205_v63, 0.0 }
 0x968   :  { %701 = vadd.xlane.f32.xlu0 %v700_v18 }
 0x97e   :  { %759 = vrot.lane.b32.xlu0 %v3560_v17, %s4156_s4  ;;  %s4157_s4 = smov 24  }
 0x9f1   :  { %v699_v0 = vpop.xlane.xlu0 %698 }
 0x9f2   :  { %3206 = vrcp.f32 %v699_v0 }
 0x9f5   :  { %v702_v2 = vpop.xlane.xlu0 %701 }
 0x9f6   :  { %3208 = vrcp.f32 %v702_v2 }
 0x9f9   :  { %v760_v7 = vpop.permute.xlu0 %759 }
 0x9fa   :  { %v765_v9 = vsel %vm388_vm7, %v760_v7, 0 }
 0x9fc   :  { %v3207_v3 = vpop.eup %3206 }
 0x9fd   :  { %v705_v5 = vmul.f32 %v3207_v3, %v3203_v61 }
 0xa00   :  { %v3209_v4 = vpop.eup %3208 }
 0xa01   :  { %v706_v6 = vmul.f32 %v3209_v4, %v3205_v63 }
 0xa03   :  { %v707_v8 = vpack.c.bf16 %v706_v6, %v705_v5 }
 0xa05   :  { %2901 = vmatmul.mubr.msk.bf16.vlgmr.msra.gmra.mrb[24].mxu1 %vm436_vm8, %v707_v8 }
 0xa06   :  { %2905 = vmatpush3.bf16.xpose.msra.mxu1 %v765_v9  ;;  %2906 = vmatprep.mubr.msk.bf16.mxu1 %vm3300_vm6, %v3299_v52 }
 0xa07   :  { %2916 = vmatprep.subr.bf16.mxu1 %v3299_v52 }
 0xa0d   :  { %2907 = vmatmul.mubr.msk.bf16.vlgmr.msra.gmra.mrb[28].mxu1 %vm388_vm7, %v758_v10 }
 0xa0e   :  { %2920 = vmatprep.mubr.msk.bf16.mxu1 %vm3300_vm6, %v3299_v52 }
 0xad8   :  { %v750_v11 = vpop.f32.mrb[24].mxu1 }
 0xad9   :  { %v2902_v12 = vpop.f32.mrb[25].mxu1 }
 0xada   :  { %v753_v13 = vpop.f32.mrb[26].mxu1 }
 0xadb   :  { %v3087_v14 = vpack.i.bf16 %v753_v13, %v750_v11  ;;  %v2903_v15 = vpop.f32.mrb[27].mxu1 }
 0xae0   :  { %v801_v16 = vpop.f32.mrb[28].mxu1 }
 0xae1   :  { %v802_v20 = vadd.f32 %v801_v16, %v3579_v22  ;;  %v2908_v21 = vpop.f32.mrb[29].mxu1 }
 0xae2   :  { %v804_v23 = vpop.f32.mrb[30].mxu1 }
 0xae3   :  { %v805_v25 = vadd.f32 %v804_v23, %v3584_v24  ;;  %v2909_v27 = vpop.f32.mrb[31].mxu1  ;;  %v808_v28 = vsel %vm436_vm8, %v802_v20, -inf }
 0xae4   :  { %809 = vmax.xlane.f32.xlu1 %v808_v28 }
 0xae5   :  { %v811_v29 = vsel %vm440_vm9, %v805_v25, -inf }
 0xae6   :  { %812 = vmax.xlane.f32.xlu0 %v811_v29 }
 0xb71   :  { %v810_v30 = vpop.xlane.xlu1 %809 }
 0xb72   :  { %v814_v31 = vsub.f32 %v802_v20, %v810_v30 }
 0xb73   :  { %v813_v32 = vpop.xlane.xlu0 %812 }
 0xb74   :  { %v816_v33 = vmul.f32 1.442695, %v814_v31  ;;  %v815_v34 = vsub.f32 %v805_v25, %v813_v32 }
 0xb76   :  { %3210 = vpow2.f32 %v816_v33  ;;  %v818_v37 = vmul.f32 1.442695, %v815_v34 }
 0xb78   :  { %3212 = vpow2.f32 %v818_v37  ;;  %v3128_v37 = vld [vmem:[%s4127_s14] sm:$0xff]  }
 0xb80   :  { %v3211_v41 = vpop.eup %3210 }
 0xb81   :  { %v820_v42 = vsel %vm436_vm8, %v3211_v41, 0.0 }
 0xb82   :  { %v3213_v43 = vpop.eup %3212  ;;  %821 = vadd.xlane.f32.xlu0 %v820_v42 }
 0xb83   :  { %v823_v44 = vsel %vm440_vm9, %v3213_v43, 0.0 }
 0xb84   :  { %824 = vadd.xlane.f32.xlu1 %v823_v44 }
 0xb95   :  { %3083 = vrot.lane.b32.xlu1 %v3082_v40, %s4152_s1 }
 0xb98   :  { %831 = vrot.lane.b32.xlu0 %v3560_v17, %s4153_s27  ;;  %s4181_s27 = sld [smem:[#allocation15_spill]] }
 0xb99   :  { %3088 = vrot.lane.b32.xlu1 %v3087_v14, %s4151_s28 }
 0xb9e   :  { %v3126_v17 = vld [vmem:[%s4181_s27] sm:$0xff]   ;;  %v3127_v51 = vld [vmem:[%s4181_s27 + $0x8] sm:$0xff]  }
 0xb9f   :  { %2917 = vmatpush3.bf16.msra.mxu1 %v3126_v17  ;;  %v2645_v17 = vld [vmem:[%s4126_s13] ss:$0 sm:$0xff] }
 0xba0   :  { %2918 = vmatprep.subr.bf16.mxu1 %v3299_v52 }
 0xba3   :  { %2919 = vmatpush3.bf16.msra.mxu1 %v3127_v51 }
 0xba4   :  { %2932 = vmatprep.subr.bf16.mxu1 %v3299_v52 }
 0xc0f   :  { %v822_v45 = vpop.xlane.xlu0 %821 }
 0xc10   :  { %3214 = vrcp.f32 %v822_v45 }
 0xc11   :  { %v825_v46 = vpop.xlane.xlu1 %824 }
 0xc12   :  { %3216 = vrcp.f32 %v825_v46 }
 0xc13   :  { %v832_v47 = vpop.permute.xlu0 %831 }
 0xc14   :  { %v837_v48 = vsel %vm260_vm2, %v832_v47, 0 }
 0xc15   :  { %2911 = vmatpush3.bf16.msra.mxu0 %v837_v48  ;;  %v3084_v59 = vpop.permute.xlu1 %3083 }
 0xc16   :  { %2924 = vmatprep.subr.bf16.mxu0 %v3299_v52  ;;  %v3086_v62 = vunpack.i.h.bf16 %v3084_v59  ;;  %v3085_v63 = vunpack.i.l.bf16 %v3084_v59  ;;  %v3132_v59 = vld [vmem:[%s4129_s16 + $0x10] sm:$0xff]  }
 0xc18   :  { %v905_v3 = vsel %vm388_vm7, %v3606_v60, %v3086_v62  ;;  %v904_v4 = vsel %vm388_vm7, %v3604_v58, %v3085_v63  ;;  %v2640_v58 = vld [vmem:[%s4124_s11] ss:$0 sm:$0xff]  ;;  %v3135_v63 = vld [vmem:[%s4129_s16 + $0x28] sm:$0xff]  }
 0xc19   :  { %v3089_v61 = vpop.permute.xlu1 %3088  ;;  %v3134_v62 = vld [vmem:[%s4129_s16 + $0x20] sm:$0xff]  }
 0xc1a   :  { %v3215_v49 = vpop.eup %3214  ;;  %v3091_v18 = vunpack.i.h.bf16 %v3089_v61  ;;  %v3090_v0 = vunpack.i.l.bf16 %v3089_v61  ;;  %v3133_v61 = vld [vmem:[%s4129_s16 + $0x18] sm:$0xff]  }
 0xc1b   :  { %v828_v39 = vmul.f32 %v3215_v49, %v3211_v41  ;;  %v3129_v41 = vld [vmem:[%s4127_s14 + $0x8] sm:$0xff]  }
 0xc1c   :  { %v3217_v36 = vpop.eup %3216  ;;  %v907_v7 = vsel %vm906_vm10, %v904_v4, %v3090_v0  ;;  %v908_v8 = vsel %vm906_vm10, %v905_v3, %v3091_v18  ;;  %v3136_v18 = vld [vmem:[%s4129_s16 + $0x30] sm:$0xff]   ;;  %v3137_v0 = vld [vmem:[%s4129_s16 + $0x38] sm:$0xff]  }
 0xc1d   :  { %v829_v40 = vmul.f32 %v3217_v36, %v3213_v43  ;;  %v2644_v36 = vld [vmem:[%s4125_s12] ss:$0 sm:$0xff] }
 0xc1f   :  { %v830_v50 = vpack.c.bf16 %v829_v40, %v828_v39 }
 0xc21   :  { %2913 = vmatmul.mubr.msk.bf16.vlgmr.msra.gmra.mrb[4].mxu0 %vm436_vm8, %v830_v50 }
 0xc22   :  { %2928 = vmatprep.mubr.msk.bf16.mxu0 %vm3300_vm6, %v3299_v52  ;;  %2925 = vmatpush3.bf16.msra.mxu0 %v3128_v37 }
 0xc23   :  { %2926 = vmatprep.subr.bf16.mxu0 %v3299_v52 }
 0xc26   :  { %2927 = vmatpush3.bf16.msra.mxu0 %v3129_v41 }
 0xc27   :  { %2952 = vmatprep.subr.bf16.mxu0 %v3299_v52 }
 0xcf4   :  { %v873_v53 = vpop.f32.mrb[4].mxu0 }
 0xcf5   :  { %v2914_v54 = vpop.f32.mrb[5].mxu0 }
 0xcf6   :  { %v876_v55 = vpop.f32.mrb[6].mxu0 }
 0xcf7   :  { %v3092_v56 = vpack.i.bf16 %v876_v55, %v873_v53  ;;  %v2915_v57 = vpop.f32.mrb[7].mxu0 }
 0xcf8   :  { %v3131_v57 = vld [vmem:[%s4129_s16 + $0x8] sm:$0xff]  }
 0xcf9   :  { %3093 = vrot.lane.b32.xlu1 %v3092_v56, %s4157_s4  ;;  %v3130_v56 = vld [vmem:[%s4129_s16] sm:$0xff]   ;;  %s4187_s4 = smov 104  }
 0xd6b   :  { %v3094_v2 = vpop.permute.xlu1 %3093 }
 0xd6c   :  { %v3096_v5 = vunpack.i.h.bf16 %v3094_v2  ;;  %v3095_v6 = vunpack.i.l.bf16 %v3094_v2  ;;  %v2646_v2 = vld [vmem:[%s4128_s15] ss:$0 sm:$0xff] }
 0xd6e   :  { %v911_v9 = vsel %vm909_vm11, %v908_v8, %v3096_v5  ;;  %v910_v10 = vsel %vm909_vm11, %v907_v7, %v3095_v6 }
 0xd6f   :  { %v912_v11 = vpack.c.bf16 %v911_v9, %v910_v10 }
 0xd71   :  { %2921 = vmatmul.mubr.msk.bf16.vlgmr.msra.gmra.mrb[32].mxu1 %vm268_vm4, %v912_v11 }
 0xd72   :  { %2948 = vmatprep.mubr.msk.bf16.mxu1 %vm3300_vm6, %v3299_v52  ;;  %2933 = vmatpush3.bf16.msra.mxu1 %v3130_v56 }
 0xd73   :  { %2934 = vmatprep.subr.bf16.mxu1 %v3299_v52 }
 0xd76   :  { %2935 = vmatpush3.bf16.msra.mxu1 %v3131_v57 }
 0xd77   :  { %2936 = vmatprep.subr.bf16.mxu1 %v3299_v52 }
 0xd7a   :  { %2937 = vmatpush3.bf16.msra.mxu1 %v3132_v59 }
 0xd7b   :  { %2938 = vmatprep.subr.bf16.mxu1 %v3299_v52 }
 0xd7e   :  { %2939 = vmatpush3.bf16.msra.mxu1 %v3133_v61 }
 0xd7f   :  { %2940 = vmatprep.subr.bf16.mxu1 %v3299_v52 }
 0xd82   :  { %2941 = vmatpush3.bf16.msra.mxu1 %v3134_v62 }
 0xd83   :  { %2942 = vmatprep.subr.bf16.mxu1 %v3299_v52 }
 0xd86   :  { %2943 = vmatpush3.bf16.msra.mxu1 %v3135_v63 }
 0xd87   :  { %2944 = vmatprep.subr.bf16.mxu1 %v3299_v52 }
 0xd8a   :  { %2945 = vmatpush3.bf16.msra.mxu1 %v3136_v18  ;;  %v2661_v18 = vld [vmem:[%s4177_s8 + $0x1] ss:$0 sm:$0xff]  ;;  %s4182_s8 = smov 120  }
 0xd8b   :  { %2946 = vmatprep.subr.bf16.mxu1 %v3299_v52 }
 0xd8e   :  { %2947 = vmatpush3.bf16.msra.mxu1 %v3137_v0 }
 0xd8f   :  { %2978 = vmatprep.subr.bf16.mxu1 %v3299_v52 }
 0xe44   :  { %v973_v60 = vpop.f32.mrb[32].mxu1 }
 0xe45   :  { %v974_v12 = vadd.f32 %v2640_v58, %v973_v60  ;;  %v2922_v13 = vpop.f32.mrb[33].mxu1 }
 0xe46   :  { %v976_v14 = vpop.f32.mrb[34].mxu1 }
 0xe47   :  { %v3700_v15 = vadd.f32 %v974_v12, %v3524_v38  ;;  %v977_v16 = vadd.f32 %v2640_v58, %v976_v14  ;;  %v2923_v20 = vpop.f32.mrb[35].mxu1 }
 0xe49   :  { %v3703_v21 = vadd.f32 %v977_v16, %v3519_v35  ;;  %v984_v23 = vsel %vm268_vm4, %v3700_v15, 0.0 }
 0xe4a   :  { %985 = vadd.xlane.f32.xlu0 %v984_v23 }
 0xe4b   :  { %v987_v25 = vsel %vm272_vm5, %v3703_v21, 0.0 }
 0xe4c   :  { %988 = vadd.xlane.f32.xlu1 %v987_v25 }
 0xed7   :  { %v986_v27 = vpop.xlane.xlu0 %985 }
 0xed8   :  { %v990_v28 = vmul.f32 0.03125, %v986_v27 }
 0xed9   :  { %v989_v29 = vpop.xlane.xlu1 %988 }
 0xeda   :  { %v992_v30 = vsub.f32 %v3700_v15, %v990_v28  ;;  %v991_v38 = vmul.f32 0.03125, %v989_v29 }
 0xedc   :  { %v993_v31 = vsub.f32 %v3703_v21, %v991_v38  ;;  %v994_v32 = vmul.f32 %v992_v30, %v992_v30 }
 0xede   :  { %v996_v35 = vsel %vm268_vm4, %v994_v32, 0.0  ;;  %v995_v33 = vmul.f32 %v993_v31, %v993_v31 }
 0xedf   :  { %997 = vadd.xlane.f32.xlu0 %v996_v35  ;;  %v2650_v35 = vld [vmem:[%s4130_s17] ss:$0 sm:$0xff] }
 0xee0   :  { %v999_v34 = vsel %vm272_vm5, %v995_v33, 0.0 }
 0xee3   :  { %1000 = vadd.xlane.f32.xlu0 %v999_v34 }
 0xf6c   :  { %v998_v42 = vpop.xlane.xlu0 %997 }
 0xf6d   :  { %v1002_v43 = vmul.f32 0.03125, %v998_v42 }
 0xf6f   :  { %v1004_v44 = vadd.f32 1e-12, %v1002_v43 }
 0xf70   :  { %v1001_v45 = vpop.xlane.xlu0 %1000 }
 0xf71   :  { %3218 = vrsqrt.f32 %v1004_v44  ;;  %v1003_v46 = vmul.f32 0.03125, %v1001_v45 }
 0xf73   :  { %v1005_v47 = vadd.f32 1e-12, %v1003_v46 }
 0xf75   :  { %3220 = vrsqrt.f32 %v1005_v47 }
 0xf7b   :  { %v3219_v48 = vpop.eup %3218 }
 0xf7c   :  { %v1008_v49 = vmul.f32 %v3219_v48, %v992_v30 }
 0xf7e   :  { %v1016_v40 = vmul.f32 %v2644_v36, %v1008_v49 }
 0xf7f   :  { %v3221_v39 = vpop.eup %3220 }
 0xf80   :  { %v1009_v50 = vmul.f32 %v3221_v39, %v993_v31  ;;  %v1024_v53 = vadd.f32 %v2645_v17, %v1016_v40 }
 0xf82   :  { %v1017_v51 = vmul.f32 %v2644_v36, %v1009_v50 }
 0xf84   :  { %v1025_v54 = vadd.f32 %v2645_v17, %v1017_v51 }
 0xf86   :  { %v1026_v55 = vpack.c.bf16 %v1025_v54, %v1024_v53  ;;  %v3138_v53 = vld [vmem:[%s4176_s10 + $0x10] sm:$0xff]   ;;  %v3139_v54 = vld [vmem:[%s4176_s10 + $0x18] sm:$0xff]  }
 0xf88   :  { %2929 = vmatmul.mubr.msk.bf16.vlgmr.msra.gmra.mrb[8].mxu0 %vm268_vm4, %v1026_v55 }
 0xf89   :  { %2956 = vmatprep.mubr.msk.bf16.mxu0 %vm3300_vm6, %v3299_v52  ;;  %2953 = vmatpush3.bf16.msra.mxu0 %v3138_v53 }
 0xf8a   :  { %2954 = vmatprep.subr.bf16.mxu0 %v3299_v52 }
 0xf8d   :  { %2955 = vmatpush3.bf16.msra.mxu0 %v3139_v54 }
 0xf8e   :  { %2960 = vmatprep.subr.bf16.mxu0 %v3299_v52 }
0x105b   :  { %v1087_v3 = vpop.f32.mrb[8].mxu0 }
0x105c   :  { %v1088_v4 = vadd.f32 %v2646_v2, %v1087_v3  ;;  %v2930_v5 = vpop.f32.mrb[9].mxu0 }
0x105d   :  { %v1090_v6 = vpop.f32.mrb[10].mxu0  ;;  %v2662_v5 = vld [vmem:[%s4178_s7 + $0x1] ss:$0 sm:$0xff]  ;;  %s4183_s7 = smov 80  }
0x105e   :  { %v1094_v7 = vmul.f32 %v1088_v4, %v1088_v4  ;;  %v1091_v8 = vadd.f32 %v2646_v2, %v1090_v6  ;;  %v2931_v9 = vpop.f32.mrb[11].mxu0 }
0x1060   :  { %v1096_v10 = vmul.f32 %v1094_v7, %v1088_v4  ;;  %v1095_v11 = vmul.f32 %v1091_v8, %v1091_v8 }
0x1062   :  { %v1098_v58 = vmul.f32 0.044715, %v1096_v10  ;;  %v1097_v60 = vmul.f32 %v1095_v11, %v1091_v8  ;;  %v2668_v10 = vld [vmem:[%s4179_s6 + $0x1] ss:$0 sm:$0xff]  ;;  %s4184_s6 = smov 72  }
0x1064   :  { %v1100_v12 = vadd.f32 %v1098_v58, %v1088_v4  ;;  %v1099_v13 = vmul.f32 0.044715, %v1097_v60 }
0x1066   :  { %v1102_v14 = vmul.f32 0.7978846, %v1100_v12  ;;  %v1101_v16 = vadd.f32 %v1099_v13, %v1091_v8 }
0x1068   :  { %3222 = vtanh.f32 %v1102_v14  ;;  %v1103_v20 = vmul.f32 0.7978846, %v1101_v16 }
0x106a   :  { %3224 = vtanh.f32 %v1103_v20 }
0x1072   :  { %v3223_v23 = vpop.eup %3222 }
0x1073   :  { %v1106_v25 = vadd.f32 1.0, %v3223_v23 }
0x1074   :  { %v3225_v27 = vpop.eup %3224 }
0x1075   :  { %v1108_v28 = vmul.f32 0.5, %v1106_v25  ;;  %v1107_v29 = vadd.f32 1.0, %v3225_v27 }
0x1077   :  { %v1109_v30 = vmul.f32 0.5, %v1107_v29  ;;  %v1110_v38 = vmul.f32 %v1108_v28, %v1088_v4 }
0x1079   :  { %v1111_v31 = vmul.f32 %v1109_v30, %v1091_v8 }
0x107b   :  { %v1112_v32 = vpack.c.bf16 %v1111_v31, %v1110_v38 }
0x107d   :  { %2949 = vmatmul.mubr.bf16.vlgmr.msra.gmra.mrb[36].mxu1 %v1112_v32 }
0x107e   :  { %2980 = vmatprep.mubr.msk.bf16.mxu1 %vm3300_vm6, %v3299_v52 }
0x1150   :  { %v1218_v33 = vpop.f32.mrb[36].mxu1 }
0x1151   :  { %v1219_v34 = vadd.f32 %v2650_v35, %v1218_v33  ;;  %v2950_v37 = vpop.f32.mrb[37].mxu1 }
0x1152   :  { %v1221_v41 = vpop.f32.mrb[38].mxu1 }
0x1153   :  { %v3771_v42 = vadd.f32 %v1219_v34, %v3700_v15  ;;  %v1222_v43 = vadd.f32 %v2650_v35, %v1221_v41  ;;  %v2951_v44 = vpop.f32.mrb[39].mxu1 }
0x1155   :  { %v3774_v45 = vadd.f32 %v1222_v43, %v3703_v21  ;;  %v1231_v46 = vsel %vm268_vm4, %v3771_v42, 0.0 }
0x1156   :  { %1232 = vadd.xlane.f32.xlu0 %v1231_v46 }
0x1157   :  { %v1234_v47 = vsel %vm272_vm5, %v3774_v45, 0.0 }
0x1158   :  { %1235 = vadd.xlane.f32.xlu1 %v1234_v47 }
0x11e3   :  { %v1233_v48 = vpop.xlane.xlu0 %1232 }
0x11e4   :  { %v1237_v49 = vmul.f32 0.03125, %v1233_v48 }
0x11e5   :  { %v1236_v36 = vpop.xlane.xlu1 %1235 }
0x11e6   :  { %v1239_v39 = vsub.f32 %v3771_v42, %v1237_v49  ;;  %v1238_v15 = vmul.f32 0.03125, %v1236_v36 }
0x11e8   :  { %v1240_v40 = vsub.f32 %v3774_v45, %v1238_v15  ;;  %v1241_v50 = vmul.f32 %v1239_v39, %v1239_v39 }
0x11ea   :  { %v1243_v21 = vsel %vm268_vm4, %v1241_v50, 0.0  ;;  %v1242_v17 = vmul.f32 %v1240_v40, %v1240_v40 }
0x11eb   :  { %1244 = vadd.xlane.f32.xlu0 %v1243_v21 }
0x11ec   :  { %v1246_v51 = vsel %vm272_vm5, %v1242_v17, 0.0 }
0x11ed   :  { %1247 = vadd.xlane.f32.xlu1 %v1246_v51 }
0x1278   :  { %v1245_v55 = vpop.xlane.xlu0 %1244 }
0x1279   :  { %v1249_v56 = vmul.f32 0.03125, %v1245_v55 }
0x127a   :  { %v1248_v57 = vpop.xlane.xlu1 %1247 }
0x127b   :  { %v1251_v59 = vadd.f32 1e-12, %v1249_v56  ;;  %v1250_v61 = vmul.f32 0.03125, %v1248_v57 }
0x127d   :  { %3226 = vrsqrt.f32 %v1251_v59  ;;  %v1252_v62 = vadd.f32 1e-12, %v1250_v61 }
0x127f   :  { %3228 = vrsqrt.f32 %v1252_v62 }
0x1287   :  { %v3227_v63 = vpop.eup %3226 }
0x1288   :  { %v1255_v0 = vmul.f32 %v3227_v63, %v1239_v39 }
0x1289   :  { %v3229_v2 = vpop.eup %3228 }
0x128a   :  { %v1263_v3 = vmul.f32 %v2661_v18, %v1255_v0  ;;  %v1256_v4 = vmul.f32 %v3229_v2, %v1240_v40 }
0x128c   :  { %v1264_v6 = vmul.f32 %v2661_v18, %v1256_v4  ;;  %v1271_v7 = vadd.f32 %v2662_v5, %v1263_v3 }
0x128e   :  { %v1272_v8 = vadd.f32 %v2662_v5, %v1264_v6 }
0x1290   :  { %v1273_v9 = vpack.c.bf16 %v1272_v8, %v1271_v7 }
0x1292   :  { %2957 = vmatmul.mubr.msk.bf16.vlgmr.msra.gmra.mrb[12].mxu0 %vm268_vm4, %v1273_v9 }
0x1293   :  { %2962 = vmatprep.mubr.msk.bf16.mxu0 %vm3300_vm6, %v3299_v52 }
0x1365   :  { %v1336_v11 = vpop.f32.mrb[12].mxu0 }
0x1366   :  { %v1337_v58 = vadd.f32 %v2668_v10, %v1336_v11  ;;  %v2958_v60 = vpop.f32.mrb[13].mxu0 }
0x1367   :  { %v1339_v12 = vpop.f32.mrb[14].mxu0 }
0x1368   :  { %v1340_v13 = vadd.f32 %v2668_v10, %v1339_v12  ;;  %v2959_v14 = vpop.f32.mrb[15].mxu0  ;;  %v1343_v16 = vmul.f32 0.35355338, %v1337_v58 }
0x136a   :  { %v1344_v20 = vmul.f32 0.35355338, %v1340_v13  ;;  %v3804_v23 = vpack.c.bf16 %v1340_v13, %v1337_v58 }
0x136c   :  { %v1345_v25 = vpack.c.bf16 %v1344_v20, %v1343_v16  ;;  %1348 = vrot.lane.b32.xlu0 %v3804_v23, %s3301_s30  ;;  %s4185_s30 = smov 64  }
0x1370   :  { %1472 = vrot.lane.b32.xlu0 %v3804_v23, %s3302_s2  ;;  %s4186_s2 = smov 112  }
0x1374   :  { %1470 = vrot.lane.b32.xlu0 %v1345_v25, %s4182_s8 }
0x1378   :  { %1595 = vrot.lane.b32.xlu0 %v3804_v23, %s4183_s7  ;;  %s4191_s7 = smov 8  }
0x137c   :  { %1718 = vrot.lane.b32.xlu0 %v3804_v23, %s4184_s6  ;;  %s4192_s6 = smov 16  }
0x13de   :  { %v1349_v27 = vpop.permute.xlu0 %1348 }
0x13df   :  { %v1354_v28 = vsel %vm388_vm7, %v1349_v27, 0 }
0x13e0   :  { %2961 = vmatpush3.bf16.xpose.msra.mxu0 %v1354_v28 }
0x13e1   :  { %2966 = vmatprep.subr.bf16.mxu0 %v3299_v52 }
0x13e2   :  { %v1473_v51 = vpop.permute.xlu0 %1472 }
0x13e3   :  { %v1478_v59 = vsel %vm388_vm7, %v1473_v51, 0 }
0x13e6   :  { %v1471_v57 = vpop.permute.xlu0 %1470 }
0x13e7   :  { %2963 = vmatmul.mubr.msk.bf16.vlgmr.msra.gmra.mrb[16].mxu0 %vm388_vm7, %v1345_v25 }
0x13e8   :  { %2968 = vmatprep.mubr.msk.bf16.mxu0 %vm3300_vm6, %v3299_v52 }
0x13ea   :  { %v1596_v61 = vpop.permute.xlu0 %1595 }
0x13eb   :  { %v1601_v62 = vsel %vm388_vm7, %v1596_v61, 0 }
0x13ee   :  { %v1719_v63 = vpop.permute.xlu0 %1718 }
0x13ef   :  { %v1724_v0 = vsel %vm388_vm7, %v1719_v63, 0 }
0x14ba   :  { %v1390_v29 = vpop.f32.mrb[16].mxu0 }
0x14bb   :  { %v1391_v30 = vadd.f32 %v1390_v29, %v3579_v22  ;;  %v2964_v38 = vpop.f32.mrb[17].mxu0 }
0x14bc   :  { %v1393_v31 = vpop.f32.mrb[18].mxu0  ;;  %v3272_v38 = vld [vmem:[%s4180_s3] sm:$0xff] }
0x14bd   :  { %v1394_v32 = vadd.f32 %v1393_v31, %v3584_v24  ;;  %v2965_v35 = vpop.f32.mrb[19].mxu0  ;;  %v1397_v33 = vsel %vm436_vm8, %v1391_v30, -inf }
0x14be   :  { %1398 = vmax.xlane.f32.xlu1 %v1397_v33 }
0x14bf   :  { %v1400_v34 = vsel %vm440_vm9, %v1394_v32, -inf }
0x14c2   :  { %1401 = vmax.xlane.f32.xlu1 %v1400_v34 }
0x154b   :  { %v1399_v37 = vpop.xlane.xlu1 %1398 }
0x154c   :  { %v1403_v41 = vsub.f32 %v1391_v30, %v1399_v37 }
0x154e   :  { %v1405_v43 = vmul.f32 1.442695, %v1403_v41 }
0x154f   :  { %v1402_v44 = vpop.xlane.xlu1 %1401 }
0x1550   :  { %3230 = vpow2.f32 %v1405_v43  ;;  %v1404_v46 = vsub.f32 %v1394_v32, %v1402_v44 }
0x1552   :  { %v1407_v47 = vmul.f32 1.442695, %v1404_v46 }
0x1554   :  { %3232 = vpow2.f32 %v1407_v47 }
0x155a   :  { %v3231_v48 = vpop.eup %3230 }
0x155b   :  { %v1409_v49 = vsel %vm436_vm8, %v3231_v48, 0.0 }
0x155c   :  { %1410 = vadd.xlane.f32.xlu1 %v1409_v49 }
0x155e   :  { %v3233_v36 = vpop.eup %3232 }
0x155f   :  { %v1412_v39 = vsel %vm440_vm9, %v3233_v36, 0.0 }
0x1560   :  { %1413 = vadd.xlane.f32.xlu1 %v1412_v39 }
0x1571   :  { %1420 = vrot.lane.b32.xlu1 %v3804_v23, %s4185_s30 }
0x1575   :  { %1593 = vrot.lane.b32.xlu1 %v1345_v25, %s4186_s2 }
0x1579   :  { %1716 = vrot.lane.b32.xlu1 %v1345_v25, %s4187_s4  ;;  %s4193_s4 = smov 24  }
0x15e9   :  { %v1411_v15 = vpop.xlane.xlu1 %1410 }
0x15ea   :  { %3234 = vrcp.f32 %v1411_v15 }
0x15ed   :  { %v1414_v40 = vpop.xlane.xlu1 %1413 }
0x15ee   :  { %3236 = vrcp.f32 %v1414_v40 }
0x15f1   :  { %v1421_v50 = vpop.permute.xlu1 %1420 }
0x15f2   :  { %v1426_v21 = vsel %vm260_vm2, %v1421_v50, 0 }
0x15f3   :  { %2967 = vmatpush3.bf16.msra.mxu0 %v1426_v21 }
0x15f4   :  { %2972 = vmatprep.subr.bf16.mxu0 %v3299_v52  ;;  %v3235_v17 = vpop.eup %3234 }
0x15f5   :  { %v1417_v54 = vmul.f32 %v3235_v17, %v3231_v48  ;;  %v1594_v18 = vpop.permute.xlu1 %1593 }
0x15f8   :  { %v3237_v53 = vpop.eup %3236 }
0x15f9   :  { %v1418_v55 = vmul.f32 %v3237_v53, %v3233_v36  ;;  %v1717_v2 = vpop.permute.xlu1 %1716 }
0x15fb   :  { %v1419_v56 = vpack.c.bf16 %v1418_v55, %v1417_v54 }
0x15fd   :  { %2969 = vmatmul.mubr.msk.bf16.vlgmr.msra.gmra.mrb[20].mxu0 %vm436_vm8, %v1419_v56 }
0x15fe   :  { %2973 = vmatpush3.bf16.xpose.msra.mxu0 %v1478_v59  ;;  %2974 = vmatprep.mubr.msk.bf16.mxu0 %vm3300_vm6, %v3299_v52 }
0x15ff   :  { %2984 = vmatprep.subr.bf16.mxu0 %v3299_v52 }
0x1605   :  { %2975 = vmatmul.mubr.msk.bf16.vlgmr.msra.gmra.mrb[24].mxu0 %vm388_vm7, %v1471_v57 }
0x1606   :  { %2985 = vmatpush3.bf16.xpose.msra.mxu0 %v1601_v62  ;;  %2986 = vmatprep.mubr.msk.bf16.mxu0 %vm3300_vm6, %v3299_v52 }
0x1607   :  { %2996 = vmatprep.subr.bf16.mxu0 %v3299_v52 }
0x160d   :  { %2987 = vmatmul.mubr.msk.bf16.vlgmr.msra.gmra.mrb[28].mxu0 %vm388_vm7, %v1594_v18 }
0x160e   :  { %2997 = vmatpush3.bf16.xpose.msra.mxu0 %v1724_v0  ;;  %2998 = vmatprep.mubr.msk.bf16.mxu0 %vm3300_vm6, %v3299_v52 }
0x160f   :  { %3008 = vmatprep.subr.bf16.mxu0 %v3299_v52 }
0x1615   :  { %2999 = vmatmul.mubr.msk.bf16.vlgmr.msra.gmra.mrb[32].mxu0 %vm388_vm7, %v1717_v2 }
0x1616   :  { %3012 = vmatprep.mubr.msk.bf16.mxu0 %vm3300_vm6, %v3299_v52 }
0x16d0   :  { %v3850_v3 = vpop.f32.mrb[20].mxu0 }
0x16d1   :  { %v2970_v4 = vpop.f32.mrb[21].mxu0 }
0x16d2   :  { %v3852_v5 = vpop.f32.mrb[22].mxu0 }
0x16d3   :  { %v2971_v6 = vpop.f32.mrb[23].mxu0 }
0x16d8   :  { %v1514_v7 = vpop.f32.mrb[24].mxu0 }
0x16d9   :  { %v1515_v8 = vadd.f32 %v1514_v7, %v3579_v22  ;;  %v2976_v9 = vpop.f32.mrb[25].mxu0 }
0x16da   :  { %v1517_v10 = vpop.f32.mrb[26].mxu0 }
0x16db   :  { %v1518_v11 = vadd.f32 %v1517_v10, %v3584_v24  ;;  %v2977_v58 = vpop.f32.mrb[27].mxu0  ;;  %v1521_v60 = vsel %vm436_vm8, %v1515_v8, -inf }
0x16dc   :  { %1522 = vmax.xlane.f32.xlu0 %v1521_v60 }
0x16dd   :  { %v1524_v12 = vsel %vm440_vm9, %v1518_v11, -inf }
0x16de   :  { %1525 = vmax.xlane.f32.xlu1 %v1524_v12 }
0x16e0   :  { %v1637_v13 = vpop.f32.mrb[28].mxu0 }
0x16e1   :  { %v1638_v14 = vadd.f32 %v1637_v13, %v3579_v22  ;;  %v2988_v16 = vpop.f32.mrb[29].mxu0  ;;  %v3273_v22 = vld [vmem:[%s4180_s3 + $0x8] sm:$0x3]  ;;  %s4188_s3 = smov 48  }
0x16e2   :  { %v1640_v20 = vpop.f32.mrb[30].mxu0 }
0x16e3   :  { %v1641_v25 = vadd.f32 %v1640_v20, %v3584_v24  ;;  %v2989_v27 = vpop.f32.mrb[31].mxu0  ;;  %v1644_v28 = vsel %vm436_vm8, %v1638_v14, -inf }
0x16e4   :  { %1645 = vmax.xlane.f32.xlu0 %v1644_v28 }
0x16e5   :  { %v1647_v29 = vsel %vm440_vm9, %v1641_v25, -inf }
0x16e8   :  { %1648 = vmax.xlane.f32.xlu0 %v1647_v29  ;;  %v1760_v30 = vpop.f32.mrb[32].mxu0 }
0x16e9   :  { %v1761_v31 = vadd.f32 %v3272_v38, %v1760_v30  ;;  %v3000_v32 = vpop.f32.mrb[33].mxu0 }
0x16ea   :  { %v1763_v35 = vpop.f32.mrb[34].mxu0 }
0x16eb   :  { %v1764_v24 = vadd.f32 %v3273_v22, %v1763_v35  ;;  %v3001_v33 = vpop.f32.mrb[35].mxu0  ;;  %v1767_v34 = vsel %vm436_vm8, %v1761_v31, -inf }
0x16ec   :  { %1768 = vmax.xlane.f32.xlu0 %v1767_v34 }
0x16ed   :  { %v1770_v37 = vsel %vm440_vm9, %v1764_v24, -inf }
0x16ee   :  { %1771 = vmax.xlane.f32.xlu1 %v1770_v37 }
0x1769   :  { %v1523_v41 = vpop.xlane.xlu0 %1522 }
0x176a   :  { %v1527_v43 = vsub.f32 %v1515_v8, %v1523_v41 }
0x176b   :  { %v1526_v44 = vpop.xlane.xlu1 %1525 }
0x176c   :  { %v1529_v46 = vmul.f32 1.442695, %v1527_v43  ;;  %v1528_v47 = vsub.f32 %v1518_v11, %v1526_v44 }
0x176e   :  { %3238 = vpow2.f32 %v1529_v46  ;;  %v1531_v48 = vmul.f32 1.442695, %v1528_v47  ;;  %v3140_v47 = vld [vmem:[%s4181_s27 + $0x10] sm:$0xff]  }
0x176f   :  { %3009 = vmatpush3.bf16.msra.mxu0 %v3140_v47 }
0x1770   :  { %3240 = vpow2.f32 %v1531_v48  ;;  %3010 = vmatprep.subr.bf16.mxu0 %v3299_v52 }
0x1771   :  { %v1646_v49 = vpop.xlane.xlu0 %1645 }
0x1772   :  { %v1650_v36 = vsub.f32 %v1638_v14, %v1646_v49 }
0x1774   :  { %v1652_v39 = vmul.f32 1.442695, %v1650_v36 }
0x1775   :  { %v1649_v15 = vpop.xlane.xlu0 %1648 }
0x1776   :  { %3242 = vpow2.f32 %v1652_v39  ;;  %v1651_v40 = vsub.f32 %v1641_v25, %v1649_v15 }
0x1778   :  { %v3239_v50 = vpop.eup %3238  ;;  %v1654_v21 = vmul.f32 1.442695, %v1651_v40 }
0x1779   :  { %v1769_v17 = vpop.xlane.xlu0 %1768  ;;  %v1533_v51 = vsel %vm436_vm8, %v3239_v50, 0.0 }
0x177a   :  { %v3241_v53 = vpop.eup %3240  ;;  %3244 = vpow2.f32 %v1654_v21  ;;  %v1773_v54 = vsub.f32 %v1761_v31, %v1769_v17  ;;  %1534 = vadd.xlane.f32.xlu0 %v1533_v51  ;;  %v3141_v21 = vld [vmem:[%s4181_s27 + $0x18] sm:$0xff]  }
0x177b   :  { %v1536_v55 = vsel %vm440_vm9, %v3241_v53, 0.0  ;;  %v1772_v0 = vpop.xlane.xlu1 %1771  ;;  %3011 = vmatpush3.bf16.msra.mxu0 %v3141_v21 }
0x177c   :  { %v1775_v56 = vmul.f32 1.442695, %v1773_v54  ;;  %1537 = vadd.xlane.f32.xlu1 %v1536_v55  ;;  %v1774_v2 = vsub.f32 %v1764_v24, %v1772_v0  ;;  %3024 = vmatprep.subr.bf16.mxu0 %v3299_v52 }
0x177e   :  { %3246 = vpow2.f32 %v1775_v56  ;;  %v1777_v4 = vmul.f32 1.442695, %v1774_v2 }
0x1780   :  { %v3243_v57 = vpop.eup %3242  ;;  %3248 = vpow2.f32 %v1777_v4 }
0x1781   :  { %v1656_v59 = vsel %vm436_vm8, %v3243_v57, 0.0 }
0x1782   :  { %1657 = vadd.xlane.f32.xlu0 %v1656_v59 }
0x1784   :  { %v3245_v61 = vpop.eup %3244 }
0x1785   :  { %v1659_v62 = vsel %vm440_vm9, %v3245_v61, 0.0 }
0x1786   :  { %1660 = vadd.xlane.f32.xlu1 %v1659_v62 }
0x1788   :  { %v3247_v63 = vpop.eup %3246 }
0x1789   :  { %v1779_v18 = vsel %vm436_vm8, %v3247_v63, 0.0 }
0x178a   :  { %1780 = vadd.xlane.f32.xlu0 %v1779_v18  ;;  %v3249_v6 = vpop.eup %3248 }
0x178b   :  { %v1782_v7 = vsel %vm440_vm9, %v3249_v6, 0.0 }
0x1797   :  { %1667 = vrot.lane.b32.xlu1 %v3804_v23, %s4188_s3 }
0x17a0   :  { %1544 = vrot.lane.b32.xlu0 %v3804_v23, %s4189_s9 }
0x17bb   :  { %1783 = vadd.xlane.f32.xlu1 %v1782_v7 }
0x17cc   :  { %1790 = vrot.lane.b32.xlu1 %v3804_v23, %s4190_s5 }
0x1807   :  { %v1535_v9 = vpop.xlane.xlu0 %1534 }
0x1809   :  { %v1538_v8 = vpop.xlane.xlu1 %1537 }
0x180a   :  { %3250 = vrcp.f32 %v1538_v8 }
0x180b   :  { %3252 = vrcp.f32 %v1535_v9 }
0x180f   :  { %v1658_v10 = vpop.xlane.xlu0 %1657 }
0x1813   :  { %v1661_v11 = vpop.xlane.xlu1 %1660 }
0x1814   :  { %3254 = vrcp.f32 %v1661_v11  ;;  %v3251_v58 = vpop.eup %3250 }
0x1815   :  { %3256 = vrcp.f32 %v1658_v10  ;;  %v3253_v12 = vpop.eup %3252  ;;  %v1542_v13 = vmul.f32 %v3251_v58, %v3241_v53 }
0x1816   :  { %v1541_v16 = vmul.f32 %v3253_v12, %v3239_v50 }
0x1817   :  { %v1781_v60 = vpop.xlane.xlu0 %1780  ;;  %v1668_v25 = vpop.permute.xlu1 %1667 }
0x1818   :  { %v1543_v27 = vpack.c.bf16 %v1542_v13, %v1541_v16  ;;  %v1673_v28 = vsel %vm260_vm2, %v1668_v25, 0  ;;  %3258 = vrcp.f32 %v1781_v60 }
0x181b   :  { %v1545_v14 = vpop.permute.xlu0 %1544 }
0x181c   :  { %v1550_v20 = vsel %vm260_vm2, %v1545_v14, 0 }
0x181d   :  { %2979 = vmatpush3.bf16.msra.mxu1 %v1550_v20 }
0x181e   :  { %2990 = vmatprep.subr.bf16.mxu1 %v3299_v52  ;;  %v3255_v23 = vpop.eup %3254 }
0x181f   :  { %v3257_v29 = vpop.eup %3256  ;;  %v1665_v30 = vmul.f32 %v3255_v23, %v3245_v61 }
0x1820   :  { %2981 = vmatmul.mubr.msk.bf16.vlgmr.msra.gmra.mrb[40].mxu1 %vm436_vm8, %v1543_v27  ;;  %v1664_v38 = vmul.f32 %v3257_v29, %v3243_v57 }
0x1821   :  { %2991 = vmatpush3.bf16.msra.mxu1 %v1673_v28  ;;  %2992 = vmatprep.mubr.msk.bf16.mxu1 %vm3300_vm6, %v3299_v52 }
0x1822   :  { %3002 = vmatprep.subr.bf16.mxu1 %v3299_v52  ;;  %v1666_v31 = vpack.c.bf16 %v1665_v30, %v1664_v38  ;;  %v3259_v24 = vpop.eup %3258 }
0x1823   :  { %v1787_v34 = vmul.f32 %v3259_v24, %v3247_v63  ;;  %v3143_v24 = vld [vmem:[%s4127_s14 + $0x18] sm:$0xff]  }
0x1828   :  { %2993 = vmatmul.mubr.msk.bf16.vlgmr.msra.gmra.mrb[44].mxu1 %vm436_vm8, %v1666_v31 }
0x1829   :  { %3004 = vmatprep.mubr.msk.bf16.mxu1 %vm3300_vm6, %v3299_v52 }
0x1848   :  { %v1784_v32 = vpop.xlane.xlu1 %1783 }
0x1849   :  { %3260 = vrcp.f32 %v1784_v32 }
0x184c   :  { %v1791_v35 = vpop.permute.xlu1 %1790 }
0x184d   :  { %v1796_v22 = vsel %vm260_vm2, %v1791_v35, 0 }
0x184e   :  { %3003 = vmatpush3.bf16.msra.mxu1 %v1796_v22 }
0x184f   :  { %3016 = vmatprep.subr.bf16.mxu1 %v3299_v52 }
0x1853   :  { %v3261_v33 = vpop.eup %3260 }
0x1854   :  { %v1788_v37 = vmul.f32 %v3261_v33, %v3249_v6 }
0x1856   :  { %v1789_v41 = vpack.c.bf16 %v1788_v37, %v1787_v34 }
0x1858   :  { %3005 = vmatmul.mubr.msk.bf16.vlgmr.msra.gmra.mrb[48].mxu1 %vm436_vm8, %v1789_v41 }
0x1859   :  { %3020 = vmatprep.mubr.msk.bf16.mxu1 %vm3300_vm6, %v3299_v52 }
0x18f3   :  { %v1586_v43 = vpop.f32.mrb[40].mxu1 }
0x18f4   :  { %v2982_v44 = vpop.f32.mrb[41].mxu1 }
0x18f5   :  { %v1589_v46 = vpop.f32.mrb[42].mxu1 }
0x18f6   :  { %v3097_v48 = vpack.i.bf16 %v1589_v46, %v1586_v43  ;;  %v2983_v49 = vpop.f32.mrb[43].mxu1 }
0x18f8   :  { %3098 = vrot.lane.b32.xlu1 %v3097_v48, %s4191_s7  ;;  %v2691_v48 = vld [vmem:[%s4125_s12 + $0x1] ss:$0 sm:$0xff] }
0x18fb   :  { %v1709_v36 = vpop.f32.mrb[44].mxu1 }
0x18fc   :  { %v2994_v39 = vpop.f32.mrb[45].mxu1 }
0x18fd   :  { %v1712_v15 = vpop.f32.mrb[46].mxu1 }
0x18fe   :  { %v3102_v40 = vpack.i.bf16 %v1712_v15, %v1709_v36  ;;  %v2995_v50 = vpop.f32.mrb[47].mxu1  ;;  %v2692_v15 = vld [vmem:[%s4126_s13 + $0x1] ss:$0 sm:$0xff] }
0x1900   :  { %3103 = vrot.lane.b32.xlu0 %v3102_v40, %s4192_s6 }
0x192b   :  { %v1832_v17 = vpop.f32.mrb[48].mxu1 }
0x192c   :  { %v3006_v51 = vpop.f32.mrb[49].mxu1 }
0x192d   :  { %v1835_v53 = vpop.f32.mrb[50].mxu1  ;;  %v3144_v51 = vld [vmem:[%s4129_s16 + $0x40] sm:$0xff]  }
0x192e   :  { %v3107_v54 = vpack.i.bf16 %v1835_v53, %v1832_v17  ;;  %v3007_v55 = vpop.f32.mrb[51].mxu1  ;;  %v3145_v53 = vld [vmem:[%s4129_s16 + $0x48] sm:$0xff]  }
0x192f   :  { %v3148_v55 = vld [vmem:[%s4129_s16 + $0x60] sm:$0xff]  }
0x1930   :  { %3108 = vrot.lane.b32.xlu1 %v3107_v54, %s4193_s4  ;;  %v3146_v54 = vld [vmem:[%s4129_s16 + $0x50] sm:$0xff]  }
0x196a   :  { %v3099_v56 = vpop.permute.xlu1 %3098 }
0x196b   :  { %v3101_v59 = vunpack.i.h.bf16 %v3099_v56  ;;  %v3100_v61 = vunpack.i.l.bf16 %v3099_v56  ;;  %v3149_v56 = vld [vmem:[%s4129_s16 + $0x68] sm:$0xff]  }
0x196d   :  { %v1864_v0 = vsel %vm388_vm7, %v3852_v5, %v3101_v59  ;;  %v1863_v2 = vsel %vm388_vm7, %v3850_v3, %v3100_v61  ;;  %v2685_v3 = vld [vmem:[%s4124_s11 + $0x1] ss:$0 sm:$0xff]  ;;  %v3151_v59 = vld [vmem:[%s4129_s16 + $0x78] sm:$0xff]  }
0x196e   :  { %v2698_v61 = vld [vmem:[%s4128_s15 + $0x1] ss:$0 sm:$0xff] }
0x1972   :  { %v3104_v57 = vpop.permute.xlu0 %3103 }
0x1973   :  { %v3106_v62 = vunpack.i.h.bf16 %v3104_v57  ;;  %v3105_v63 = vunpack.i.l.bf16 %v3104_v57  ;;  %v3150_v57 = vld [vmem:[%s4129_s16 + $0x70] sm:$0xff]  }
0x1975   :  { %v1866_v7 = vsel %vm906_vm10, %v1864_v0, %v3106_v62  ;;  %v1865_v8 = vsel %vm906_vm10, %v1863_v2, %v3105_v63 }
0x19a2   :  { %v3109_v18 = vpop.permute.xlu1 %3108 }
0x19a3   :  { %v3111_v4 = vunpack.i.h.bf16 %v3109_v18  ;;  %v3110_v6 = vunpack.i.l.bf16 %v3109_v18 }
0x19a5   :  { %v1868_v9 = vsel %vm909_vm11, %v1866_v7, %v3111_v4  ;;  %v1867_v10 = vsel %vm909_vm11, %v1865_v8, %v3110_v6 }
0x19a6   :  { %v1869_v11 = vpack.c.bf16 %v1868_v9, %v1867_v10 }
0x19a8   :  { %3013 = vmatmul.mubr.msk.bf16.vlgmr.msra.gmra.mrb[36].mxu0 %vm268_vm4, %v1869_v11 }
0x19a9   :  { %3040 = vmatprep.mubr.msk.bf16.mxu0 %vm3300_vm6, %v3299_v52  ;;  %3025 = vmatpush3.bf16.msra.mxu0 %v3144_v51 }
0x19aa   :  { %3026 = vmatprep.subr.bf16.mxu0 %v3299_v52 }
0x19ad   :  { %3027 = vmatpush3.bf16.msra.mxu0 %v3145_v53 }
0x19ae   :  { %3028 = vmatprep.subr.bf16.mxu0 %v3299_v52 }
0x19b1   :  { %3029 = vmatpush3.bf16.msra.mxu0 %v3146_v54  ;;  %v3159_v54 = vld [vmem:[%s4135_s22] sm:$0xff]  }
0x19b2   :  { %3030 = vmatprep.subr.bf16.mxu0 %v3299_v52 }
0x1a7b   :  { %v1932_v5 = vpop.f32.mrb[36].mxu0 }
0x1a7c   :  { %v1933_v58 = vadd.f32 %v2685_v3, %v1932_v5  ;;  %v3014_v60 = vpop.f32.mrb[37].mxu0 }
0x1a7d   :  { %v1935_v12 = vpop.f32.mrb[38].mxu0 }
0x1a7e   :  { %v3923_v13 = vadd.f32 %v1933_v58, %v3771_v42  ;;  %v1936_v14 = vadd.f32 %v2685_v3, %v1935_v12  ;;  %v3015_v16 = vpop.f32.mrb[39].mxu0 }
0x1a80   :  { %v1945_v20 = vsel %vm268_vm4, %v3923_v13, 0.0  ;;  %v1940_v25 = vadd.f32 %v1936_v14, %v3774_v45  ;;  %v3142_v45 = vld [vmem:[%s4127_s14 + $0x10] sm:$0xff]  }
0x1a81   :  { %1946 = vadd.xlane.f32.xlu0 %v1945_v20  ;;  %3017 = vmatpush3.bf16.msra.mxu1 %v3142_v45 }
0x1a82   :  { %v1948_v27 = vsel %vm272_vm5, %v1940_v25, 0.0  ;;  %3018 = vmatprep.subr.bf16.mxu1 %v3299_v52 }
0x1a83   :  { %1949 = vadd.xlane.f32.xlu1 %v1948_v27 }
0x1a85   :  { %3019 = vmatpush3.bf16.msra.mxu1 %v3143_v24 }
0x1b0e   :  { %v1947_v23 = vpop.xlane.xlu0 %1946 }
0x1b0f   :  { %v1951_v28 = vmul.f32 0.03125, %v1947_v23 }
0x1b10   :  { %v1950_v29 = vpop.xlane.xlu1 %1949 }
0x1b11   :  { %v1953_v30 = vsub.f32 %v3923_v13, %v1951_v28  ;;  %v1952_v38 = vmul.f32 0.03125, %v1950_v29 }
0x1b13   :  { %v1954_v31 = vsub.f32 %v1940_v25, %v1952_v38  ;;  %v1955_v42 = vmul.f32 %v1953_v30, %v1953_v30 }
0x1b15   :  { %v1957_v32 = vsel %vm268_vm4, %v1955_v42, 0.0  ;;  %v1956_v35 = vmul.f32 %v1954_v31, %v1954_v31 }
0x1b16   :  { %1958 = vadd.xlane.f32.xlu0 %v1957_v32 }
0x1b17   :  { %v1960_v22 = vsel %vm272_vm5, %v1956_v35, 0.0 }
0x1b1a   :  { %1961 = vadd.xlane.f32.xlu0 %v1960_v22 }
0x1ba3   :  { %v1959_v33 = vpop.xlane.xlu0 %1958 }
0x1ba4   :  { %v1963_v34 = vmul.f32 0.03125, %v1959_v33 }
0x1ba6   :  { %v1965_v37 = vadd.f32 1e-12, %v1963_v34 }
0x1ba7   :  { %v1962_v41 = vpop.xlane.xlu0 %1961 }
0x1ba8   :  { %3262 = vrsqrt.f32 %v1965_v37  ;;  %v1964_v43 = vmul.f32 0.03125, %v1962_v41 }
0x1baa   :  { %v1966_v44 = vadd.f32 1e-12, %v1964_v43 }
0x1bac   :  { %3264 = vrsqrt.f32 %v1966_v44 }
0x1bb2   :  { %v3263_v46 = vpop.eup %3262 }
0x1bb3   :  { %v1969_v47 = vmul.f32 %v3263_v46, %v1953_v30  ;;  %v2719_v30 = vld [vmem:[%s4130_s17 + $0x1] ss:$0 sm:$0xff]  ;;  %v3154_v46 = vld [vmem:[%s4133_s20 + $0x4] ss:$8 sps:$4 sm:$0xff]  }
0x1bb4   :  { %2263 = vmatprep.subr.bf16.mxu1 %v3154_v46 }
0x1bb5   :  { %v1977_v36 = vmul.f32 %v2691_v48, %v1969_v47  ;;  %v3155_v47 = vld [vmem:[%s4133_s20 + $0x10] ss:$8 sps:$4 sm:$0xff]  }
0x1bb6   :  { %v3265_v49 = vpop.eup %3264 }
0x1bb7   :  { %v1970_v39 = vmul.f32 %v3265_v49, %v1954_v31  ;;  %v1985_v50 = vadd.f32 %v2692_v15, %v1977_v36  ;;  %v3158_v49 = vld [vmem:[%s4135_s22 + $0x40] sm:$0xff]  }
0x1bb9   :  { %v1978_v40 = vmul.f32 %v2691_v48, %v1970_v39  ;;  %v3157_v48 = vld [vmem:[%s4133_s20 + $0x14] ss:$8 sps:$4 sm:$0xff]  }
0x1bbb   :  { %v1986_v21 = vadd.f32 %v2692_v15, %v1978_v40 }
0x1bbd   :  { %v1987_v17 = vpack.c.bf16 %v1986_v21, %v1985_v50  ;;  %v2728_v50 = vld [vmem:[%s4131_s18] ss:$0 sm:$0xff] }
0x1bbf   :  { %3021 = vmatmul.mubr.msk.bf16.vlgmr.msra.gmra.mrb[52].mxu1 %vm268_vm4, %v1987_v17  ;;  %v2729_v17 = vld [vmem:[%s4132_s19] ss:$0 sm:$0xff] }
0x1bc0   :  { %2295 = vmatprep.mubr.bf16.mxu1 %v3298_v1  ;;  %v3147_v1 = vld [vmem:[%s4129_s16 + $0x58] sm:$0xff]  }
0x1bc1   :  { %3031 = vmatpush3.bf16.msra.mxu0 %v3147_v1 }
0x1bc2   :  { %3032 = vmatprep.subr.bf16.mxu0 %v3299_v52 }
0x1bc5   :  { %3033 = vmatpush3.bf16.msra.mxu0 %v3148_v55  ;;  %v3160_v55 = vld [vmem:[%s4135_s22 + $0x48] sm:$0xff]  }
0x1bc6   :  { %3034 = vmatprep.subr.bf16.mxu0 %v3299_v52 }
0x1bc9   :  { %3035 = vmatpush3.bf16.msra.mxu0 %v3149_v56  ;;  %v3161_v56 = vld [vmem:[%s4135_s22 + $0x8] sm:$0xff]  }
0x1bca   :  { %3036 = vmatprep.subr.bf16.mxu0 %v3299_v52 }
0x1bcd   :  { %3037 = vmatpush3.bf16.msra.mxu0 %v3150_v57  ;;  %v3162_v57 = vld [vmem:[%s4135_s22 + $0x50] sm:$0xff]  }
0x1bce   :  { %3038 = vmatprep.subr.bf16.mxu0 %v3299_v52 }
0x1bd1   :  { %3039 = vmatpush3.bf16.msra.mxu0 %v3151_v59  ;;  %v3163_v59 = vld [vmem:[%s4135_s22 + $0x10] sm:$0xff]  }
0x1bd2   :  { %3044 = vmatprep.subr.bf16.mxu0 %v3299_v52 }
0x1c92   :  { %v2050_v62 = vpop.f32.mrb[52].mxu1 }
0x1c93   :  { %v2051_v63 = vadd.f32 %v2698_v61, %v2050_v62  ;;  %v3022_v18 = vpop.f32.mrb[53].mxu1  ;;  %v3165_v62 = vld [vmem:[%s4135_s22 + $0x18] sm:$0xff]  }
0x1c94   :  { %v2053_v0 = vpop.f32.mrb[54].mxu1  ;;  %v3167_v18 = vld [vmem:[%s4135_s22 + $0x20] sm:$0xff]  }
0x1c95   :  { %v2057_v2 = vmul.f32 %v2051_v63, %v2051_v63  ;;  %v2054_v4 = vadd.f32 %v2698_v61, %v2053_v0  ;;  %v3023_v6 = vpop.f32.mrb[55].mxu1  ;;  %v3164_v61 = vld [vmem:[%s4135_s22 + $0x58] sm:$0xff]   ;;  %v3168_v0 = vld [vmem:[%s4135_s22 + $0x68] sm:$0xff]  }
0x1c96   :  { %v3171_v6 = vld [vmem:[%s4135_s22 + $0x30] sm:$0xff]  }
0x1c97   :  { %v2059_v7 = vmul.f32 %v2057_v2, %v2051_v63  ;;  %v2058_v8 = vmul.f32 %v2054_v4, %v2054_v4  ;;  %v3169_v2 = vld [vmem:[%s4135_s22 + $0x28] sm:$0xff]  }
0x1c99   :  { %v2061_v9 = vmul.f32 0.044715, %v2059_v7  ;;  %v2060_v10 = vmul.f32 %v2058_v8, %v2054_v4  ;;  %v3172_v7 = vld [vmem:[%s4135_s22 + $0x78] sm:$0xff]  }
0x1c9a   :  { %v3173_v8 = vld [vmem:[%s4135_s22 + $0x38] sm:$0xff]  }
0x1c9b   :  { %v2063_v11 = vadd.f32 %v2061_v9, %v2051_v63  ;;  %v2062_v3 = vmul.f32 0.044715, %v2060_v10  ;;  %v3174_v9 = vld [vmem:[%s4137_s24] sm:$0xff]   ;;  %v3175_v10 = vld [vmem:[%s4137_s24 + $0x8] sm:$0xff]  }
0x1c9d   :  { %v2065_v5 = vmul.f32 0.7978846, %v2063_v11  ;;  %v2064_v58 = vadd.f32 %v2062_v3, %v2054_v4  ;;  %v3176_v11 = vld [vmem:[%s4137_s24 + $0x10] sm:$0xff]   ;;  %v3177_v3 = vld [vmem:[%s4137_s24 + $0x18] sm:$0xff]  }
0x1c9f   :  { %3266 = vtanh.f32 %v2065_v5  ;;  %v2066_v60 = vmul.f32 0.7978846, %v2064_v58  ;;  %v3178_v5 = vld [vmem:[%s4137_s24 + $0x20] sm:$0xff]   ;;  %v3179_v58 = vld [vmem:[%s4137_s24 + $0x28] sm:$0xff]  }
0x1ca1   :  { %3268 = vtanh.f32 %v2066_v60  ;;  %v2228_v60 = vld [vmem:[%s4134_s21] sm:$0x3] }
0x1ca9   :  { %v3267_v12 = vpop.eup %3266 }
0x1caa   :  { %v2069_v14 = vadd.f32 1.0, %v3267_v12  ;;  %v2236_v12 = vsub.s32 1, %v3508_v19  ;;  %v3181_v19 = vld [vmem:[%s4137_s24 + $0x38] sm:$0xff]  }
0x1cab   :  { %v3269_v16 = vpop.eup %3268 }
0x1cac   :  { %v2071_v20 = vmul.f32 0.5, %v2069_v14  ;;  %v2070_v25 = vadd.f32 1.0, %v3269_v16  ;;  %v2233_v14 = vrot.slane %v2228_v60, %v252_v26  ;;  %v2237_v16 = vrot.slane %v2228_v60, %v2236_v12 }
0x1cae   :  { %v2072_v27 = vmul.f32 0.5, %v2070_v25  ;;  %v2073_v23 = vmul.f32 %v2071_v20, %v2051_v63  ;;  %v3166_v63 = vld [vmem:[%s4135_s22 + $0x60] sm:$0xff]  }
0x1cb0   :  { %v2074_v28 = vmul.f32 %v2072_v27, %v2054_v4  ;;  %v3170_v4 = vld [vmem:[%s4135_s22 + $0x70] sm:$0xff]  }
0x1cb2   :  { %v2075_v29 = vpack.c.bf16 %v2074_v28, %v2073_v23 }
0x1cb4   :  { %3041 = vmatmul.mubr.bf16.vlgmr.msra.gmra.mrb[40].mxu0 %v2075_v29 }
0x1cb5   :  { %3060 = vmatprep.mubr.msk.bf16.mxu0 %vm3300_vm6, %v3299_v52  ;;  %3045 = vmatpush3.bf16.msra.mxu0 %v3174_v9 }
0x1cb6   :  { %3046 = vmatprep.subr.bf16.mxu0 %v3299_v52 }
0x1cb9   :  { %3047 = vmatpush3.bf16.msra.mxu0 %v3175_v10 }
0x1cba   :  { %3048 = vmatprep.subr.bf16.mxu0 %v3299_v52 }
0x1cbd   :  { %3049 = vmatpush3.bf16.msra.mxu0 %v3176_v11 }
0x1cbe   :  { %3050 = vmatprep.subr.bf16.mxu0 %v3299_v52 }
0x1cc1   :  { %3051 = vmatpush3.bf16.msra.mxu0 %v3177_v3 }
0x1cc2   :  { %3052 = vmatprep.subr.bf16.mxu0 %v3299_v52 }
0x1cc5   :  { %3053 = vmatpush3.bf16.msra.mxu0 %v3178_v5 }
0x1cc6   :  { %3054 = vmatprep.subr.bf16.mxu0 %v3299_v52 }
0x1cc9   :  { %3055 = vmatpush3.bf16.msra.mxu0 %v3179_v58 }
0x1cca   :  { %3056 = vmatprep.subr.bf16.mxu0 %v3299_v52 }
0x1d87   :  { %v2183_v38 = vpop.f32.mrb[40].mxu0 }
0x1d88   :  { %v2184_v31 = vadd.f32 %v2719_v30, %v2183_v38  ;;  %v3042_v42 = vpop.f32.mrb[41].mxu0 }
0x1d89   :  { %v2186_v32 = vpop.f32.mrb[42].mxu0 }
0x1d8a   :  { %v2189_v35 = vadd.f32 %v2184_v31, %v3923_v13  ;;  %v3043_v22 = vpop.f32.mrb[43].mxu0  ;;  %v3152_v13 = vld [vmem:[%s4133_s20] ss:$8 sps:$4 sm:$0xff]   ;;  %v3180_v32 = vld [vmem:[%s4137_s24 + $0x30] sm:$0xff]   ;;  %s3315_s20 = smov [#allocation2]  }
0x1d8b   :  { %2264 = vmatpush1.bf16.msra.mxu1 %v3152_v13  ;;  %3057 = vmatpush3.bf16.msra.mxu0 %v3180_v32  ;;  %s2604_s24 = sshll.u32 %s3315_s20, 4  ;;  %s2605_s24 = int_to_ptr.vmem [resolvable:$true] %s2604_s24 }
0x1d8c   :  { %v2191_v45 = vrot.slane %v2189_v35, 4  ;;  %2265 = vmatprep.subr.bf16.mxu1 %v3157_v48  ;;  %3058 = vmatprep.subr.bf16.mxu0 %v3299_v52  ;;  %v2752_v52 = vld [vmem:[%s4138_s25] ss:$0 sm:$0xff]  ;;  %p3279_p1 = scmp.lt.s32.totalorder %s2605_s24, %s2605_s24 }
0x1d8e   :  { %v2193_v24 = vsel %vm258_vm1, %v2189_v35, %v2191_v45  ;;  %v2735_v35 = vld [vmem:[%s4136_s23] ss:$0 sm:$0xff]  ;;  %s3274_s23 = scalar_lea.vmem %s2605_s24, 32 }
0x1d8f   :  { %v2196_v33 = vsel %vm272_vm5, %v2193_v24, 0.0  ;;  %2266 = vmatpush1.bf16.msra.mxu1 %v3155_v47  ;;  %3059 = vmatpush3.bf16.msra.mxu0 %v3181_v19  ;;  %p3275_p0 = scmp.ne.s32.totalorder %s2605_s24, %s3274_s23  ;;  %p3280_p2 = scmp.lt.s32.totalorder %s3274_s23, %s3274_s23 }
0x1d90   :  { %2197 = vadd.xlane.f32.xlu0 %v2196_v33  ;;  %2829 = vmatprep.subr.bf16.mxu1 %v3158_v49 }
0x1d91   :  { %p3281_p3 = por %p3280_p2, %p3279_p1 }
0x1d93   :  { %p3282_p4 = pnand %p3281_p3, %p3275_p0 }
0x1e1d   :  { %v2198_v34 = vpop.xlane.xlu0 %2197 }
0x1e1e   :  { %v2199_v37 = vmul.f32 0.03125, %v2198_v34 }
0x1e20   :  { %v2200_v41 = vsub.f32 %v2193_v24, %v2199_v37 }
0x1e22   :  { %v2201_v43 = vmul.f32 %v2200_v41, %v2200_v41 }
0x1e24   :  { %v2202_v44 = vsel %vm272_vm5, %v2201_v43, 0.0 }
0x1e25   :  { %2203 = vadd.xlane.f32.xlu1 %v2202_v44 }
0x1eb2   :  { %v2204_v36 = vpop.xlane.xlu1 %2203 }
0x1eb3   :  { %v2205_v39 = vmul.f32 0.03125, %v2204_v36 }
0x1eb5   :  { %v2206_v15 = vadd.f32 1e-12, %v2205_v39 }
0x1eb7   :  { %3270 = vrsqrt.f32 %v2206_v15 }
0x1ec1   :  { %v3271_v40 = vpop.eup %3270 }
0x1ec2   :  { %v2208_v21 = vmul.f32 %v3271_v40, %v2200_v41 }
0x1ec4   :  { %v2215_v51 = vmul.f32 %v2728_v50, %v2208_v21 }
0x1ec6   :  { %v2222_v53 = vadd.f32 %v2729_v17, %v2215_v51 }
0x1ec8   :  { %v2223_v1 = vpack.c.bf16 %v2222_v53, %v2222_v53 }
0x1eca   :  { %2734 = vmatmul.mubr.msk.bf16.vlgmr.msra.gmra.mrb[56].mxu1 %vm268_vm4, %v2223_v1 }
0x1ecb   :  { %2830 = vmatpush3.bf16.msra.mxu1 %v3159_v54 }
0x1ecc   :  { %2831 = vmatprep.subr.bf16.mxu1 %v3160_v55 }
0x1ecf   :  { %2832 = vmatpush3.bf16.msra.mxu1 %v3161_v56 }
0x1ed0   :  { %2833 = vmatprep.subr.bf16.mxu1 %v3162_v57 }
0x1ed3   :  { %2834 = vmatpush3.bf16.msra.mxu1 %v3163_v59 }
0x1ed4   :  { %2835 = vmatprep.subr.bf16.mxu1 %v3164_v61 }
0x1ed7   :  { %2836 = vmatpush3.bf16.msra.mxu1 %v3165_v62 }
0x1ed8   :  { %2837 = vmatprep.subr.bf16.mxu1 %v3166_v63 }
0x1edb   :  { %2838 = vmatpush3.bf16.msra.mxu1 %v3167_v18 }
0x1edc   :  { %2839 = vmatprep.subr.bf16.mxu1 %v3168_v0 }
0x1edf   :  { %2840 = vmatpush3.bf16.msra.mxu1 %v3169_v2 }
0x1ee0   :  { %2841 = vmatprep.subr.bf16.mxu1 %v3170_v4 }
0x1ee3   :  { %2842 = vmatpush3.bf16.msra.mxu1 %v3171_v6 }
0x1ee4   :  { %2843 = vmatprep.subr.bf16.mxu1 %v3172_v7 }
0x1ee7   :  { %2844 = vmatpush3.bf16.msra.mxu1 %v3173_v8 }
0x1f9d   :  { %v2297_v20 = vpop.f32.mrb[56].mxu1 }
0x1f9e   :  { %v2298_v25 = vadd.f32 %v2297_v20, %v2233_v14  ;;  %v2299_v27 = vpop.f32.mrb[57].mxu1 }
0x1f9f   :  { %v2300_v23 = vadd.f32 %v2299_v27, %v2237_v16  ;;  %v2301_v28 = vpop.f32.mrb[58].mxu1 }
0x1fa0   :  { %v2304_v29 = vmax.f32 %v2298_v25, 0.0  ;;  %v2302_v30 = vpop.f32.mrb[59].mxu1 }
0x1fa1   :  { %v2305_v38 = vmax.f32 %v2300_v23, 0.0 }
0x1fa2   :  { %v2306_v42 = vpack.c.bf16 %v2304_v29, %v2304_v29 }
0x1fa3   :  { %v2307_v31 = vpack.c.bf16 %v2305_v38, %v2305_v38 }
0x1fa5   :  { %2475 = vmatprep.mubr.bf16.mxu1 %v2307_v31 }
0x1fa6   :  { %2476 = vmatmul.mubr.bf16.vlgmr.msra.gmra.mrb[60].mxu1 %v2306_v42 }
0x2079   :  { %v2845_v26 = vpop.f32.mrb[60].mxu1 }
0x207a   :  { %v2846_v22 = vpop.f32.mrb[61].mxu1 }
0x207b   :  { %v2847_v45 = vadd.f32 %v2846_v22, %v2845_v26  ;;  %v2848_v24 = vpop.f32.mrb[62].mxu1 }
0x207c   :  { %v2849_v33 = vpop.f32.mrb[63].mxu1 }
0x207d   :  { %v2478_v34 = vadd.f32 %v2847_v45, %v2735_v35 }
0x207f   :  { %v2483_v37 = vmax.f32 %v2478_v34, 0.0 }
0x2081   :  { %v2484_v41 = vpack.c.bf16 %v2483_v37, %v2483_v37 }
0x2083   :  { %3061 = vmatmul.mubr.bf16.vlgmr.msra.gmra.mrb[44].mxu0 %v2484_v41 }
0x2156   :  { %v2590_v43 = vpop.f32.mrb[44].mxu0 }
0x2157   :  { %v2591_v44 = vadd.f32 %v2752_v52, %v2590_v43  ;;  %v3062_v46 = vpop.f32.mrb[45].mxu0 }
0x2158   :  { %v2593_v13 = vpop.f32.mrb[46].mxu0 }
0x2159   :  { %v3063_v47 = vpop.f32.mrb[47].mxu0  ;;  %2597 = vst.msk [vmem:[#allocation2] sm:$0x3] %vm2596_vm12, %v2591_v44 }
0x215a   :  { %3285 = shalt.err (!%p3282_p4)
}
0x215b   :  { %s3286_s25 = scalar_lea.hbm %s4139_s26, 32 }
0x215c   :  { %p3287_p5 = scmp.ne.s32.totalorder %s4139_s26, %s3286_s25  ;;  %p3290_p6 = scmp.lt.u32.totalorder %s3286_s25, %s4139_s26 }
0x215e   :  { %p3292_p7 = pnand %p3290_p6, %p3287_p5 }
0x2160   :  { %3295 = shalt.err (!%p3292_p7)
}
0x2161   :  { %2607 = dma.vmem_to_hbm [thread:$0]  %s2605_s24, 32, %s4139_s26, [#allocation3]  }
0x2162   :  { %3296 = dma.done.wait [#allocation3], 32  }
0x2163   :  { %3297 = vsyncadd [#allocation3], 4294967264 }
0x2164   :  { %2611 = vsyncpa [#allocation3], 1 }

</bundles_post_ra>
